<compile_context>
chip_gen: v7x
topology: tpu7x:2x2x1
jax: 0.10.0
libtpu: 0.0.40
codegen_flags: <defaults>
</compile_context>

<pallas_src>
import functools

import jax
import jax.numpy as jnp
from jax.experimental import pallas as pl
from jax.experimental.pallas import tpu as pltpu


# ----------------------------- model config -----------------------------

IMG = 16                               # image spatial size
PATCH = 4                              # patch size -> 4x4 = 16 patches
IN_CH = 3
HIDDEN = 128                           # ViT embed dim (lane-dense stand-in for 768)
NUM_HEADS = 4
HEAD_DIM = HIDDEN // NUM_HEADS         # 32
DEPTH = 2                              # transformer blocks (stand-in for 12)
MLP_DIM = 4 * HIDDEN                   # 512
OUTPUT_DIM = 128                       # projection output dim (stand-in for 1024)
NUM_PATCHES = (IMG // PATCH) ** 2      # 16
SEQ = NUM_PATCHES + 1                  # 17 real tokens (CLS + patches)
S_PAD = 24                             # sequence padded to a multiple of 8
PATCH_K = IN_CH * PATCH * PATCH        # 48
PATCH_K_PAD = 64                       # zero-padded contraction dim for patch embed


# ----------------------------- shared kernel helpers -----------------------------

def _ln(x, g, b, eps):
    """LayerNorm over the last dim; statistics in f32."""
    m = jnp.mean(x, axis=-1, keepdims=True)
    v = jnp.mean((x - m) ** 2, axis=-1, keepdims=True)
    return (x - m) * jax.lax.rsqrt(v + eps) * g + b


# ----------------------------- Pallas kernels -----------------------------

def _patch_embed_kernel(p_ref, w_ref, b_ref, o_ref):
    p = p_ref[...].astype(jnp.bfloat16)                                  # (B*N, Kp)
    y = jnp.dot(p, w_ref[...], preferred_element_type=jnp.float32) + b_ref[...]
    o_ref[...] = y.astype(o_ref.dtype)


def _block_kernel(x_ref, ln1_g, ln1_b, qkv_w, qkv_b, proj_w, proj_b,
                  ln2_g, ln2_b, fc1_w, fc1_b, fc2_w, fc2_b, o_ref,
                  *, n_heads, head_dim, s_real, scale, eps):
    """One full transformer block for one batch element, fully VMEM-resident."""
    d = n_heads * head_dim
    x = x_ref[0]                                                         # (S_PAD, D) f32
    s_pad = x.shape[0]

    # ---- attention sub-block: LN1 -> QKV -> MHSA (all heads) -> out-proj -> residual ----
    h = _ln(x, ln1_g[...], ln1_b[...], eps).astype(jnp.bfloat16)
    qkv = jnp.dot(h, qkv_w[...], preferred_element_type=jnp.float32) + qkv_b[...]   # (S_PAD, 3D)

    # mask padded key columns (>= s_real) out of the softmax
    col = jax.lax.broadcasted_iota(jnp.int32, (s_pad, s_pad), 1)
    key_mask = jnp.where(col < s_real, 0.0, -1e30).astype(jnp.float32)

    attn = jnp.zeros((s_pad, d), jnp.float32)
    for hd in range(n_heads):
        lo = hd * head_dim
        q = qkv[:, lo:lo + head_dim].astype(jnp.bfloat16)                # (S_PAD, Dh)
        k = qkv[:, d + lo:d + lo + head_dim].astype(jnp.bfloat16)
        v = qkv[:, 2 * d + lo:2 * d + lo + head_dim].astype(jnp.bfloat16)
        # contract on the last axis of both q and k (no in-kernel transpose)
        s = jax.lax.dot_general(q, k, (((1,), (1,)), ((), ())),
                                preferred_element_type=jnp.float32)      # (S_PAD, S_PAD)
        s = s * scale + key_mask
        s = s - jnp.max(s, axis=-1, keepdims=True)
        p = jnp.exp(s)
        p = p * pl.reciprocal(jnp.sum(p, axis=-1, keepdims=True), approx=True)
        o_h = jnp.dot(p.astype(jnp.bfloat16), v, preferred_element_type=jnp.float32)
        # head-concat fused into the out-projection: acc += o_h @ W_proj[head rows]
        attn = attn + jnp.dot(o_h.astype(jnp.bfloat16),
                              proj_w[lo:lo + head_dim, :],
                              preferred_element_type=jnp.float32)
    x = x + attn + proj_b[...]

    # ---- MLP sub-block: LN2 -> FC1 + GELU -> FC2 -> residual ----
    h2 = _ln(x, ln2_g[...], ln2_b[...], eps).astype(jnp.bfloat16)
    h2 = jnp.dot(h2, fc1_w[...], preferred_element_type=jnp.float32) + fc1_b[...]
    # TODO(synk): timm ViT uses exact erf GELU; tanh approximation used here.
    h2 = jax.nn.gelu(h2, approximate=True).astype(jnp.bfloat16)
    y = jnp.dot(h2, fc2_w[...], preferred_element_type=jnp.float32) + fc2_b[...]

    o_ref[0] = (x + y).astype(o_ref.dtype)


def _heads_kernel(feat_ref, nrm_g, nrm_b,
                  pp_w, pp_b, pp_g, pp_beta,
                  gp_w, gp_b, gp_g, gp_beta,
                  patch_o_ref, glob_o_ref,
                  *, n_patches, vit_eps, head_eps):
    """Final ViT LayerNorm + patch_proj (Linear+LN) + global_proj (Linear+LN), one batch element."""
    x = _ln(feat_ref[0], nrm_g[...], nrm_b[...], vit_eps)                # (S_PAD, D) f32

    patch_x = x[1:1 + n_patches, :].astype(jnp.bfloat16)                 # (N, D)
    yp = jnp.dot(patch_x, pp_w[...], preferred_element_type=jnp.float32) + pp_b[...]
    patch_o_ref[0] = _ln(yp, pp_g[...], pp_beta[...], head_eps).astype(patch_o_ref.dtype)

    cls_x = x[0:1, :].astype(jnp.bfloat16)                               # (1, D)
    yg = jnp.dot(cls_x, gp_w[...], preferred_element_type=jnp.float32) + gp_b[...]
    glob_o_ref[0] = _ln(yg, gp_g[...], gp_beta[...], head_eps).astype(glob_o_ref.dtype)


# ----------------------------- pallas_call wrappers -----------------------------

def patch_embed(patches, w, b):
    """patches: (B*N, Kp) f32, w: (Kp, D) bf16, b: (D,) f32 -> (B*N, D) f32."""
    M, K = patches.shape
    D = w.shape[1]
    return pl.pallas_call(
        _patch_embed_kernel,
        out_shape=jax.ShapeDtypeStruct((M, D), jnp.float32),
        grid=(1,),
        in_specs=[
            pl.BlockSpec((M, K), lambda i: (0, 0)),
            pl.BlockSpec((K, D), lambda i: (0, 0)),
            pl.BlockSpec((1, D), lambda i: (0, 0)),
        ],
        out_specs=pl.BlockSpec((M, D), lambda i: (0, 0)),
    )(patches, w, b.reshape(1, D))


def transformer_block(x, blk):
    """x: (B, S_PAD, D) f32 -> (B, S_PAD, D) f32; one fused block per pallas_call."""
    B, s_pad, d = x.shape
    mlp = blk["fc1_w"].shape[1]
    bf16 = jnp.bfloat16
    row = lambda v: v.reshape(1, -1)
    wspec = lambda shape: pl.BlockSpec(shape, lambda b: (0, 0))
    return pl.pallas_call(
        functools.partial(_block_kernel, n_heads=NUM_HEADS, head_dim=HEAD_DIM,
                          s_real=SEQ, scale=HEAD_DIM ** -0.5, eps=1e-6),
        out_shape=jax.ShapeDtypeStruct((B, s_pad, d), jnp.float32),
        grid=(B,),
        in_specs=[
            pl.BlockSpec((1, s_pad, d), lambda b: (b, 0, 0)),
            wspec((1, d)), wspec((1, d)),                 # ln1 gamma/beta
            wspec((d, 3 * d)), wspec((1, 3 * d)),         # qkv
            wspec((d, d)), wspec((1, d)),                 # attn out-proj
            wspec((1, d)), wspec((1, d)),                 # ln2 gamma/beta
            wspec((d, mlp)), wspec((1, mlp)),             # fc1
            wspec((mlp, d)), wspec((1, d)),               # fc2
        ],
        out_specs=pl.BlockSpec((1, s_pad, d), lambda b: (b, 0, 0)),
        compiler_params=pltpu.CompilerParams(dimension_semantics=("parallel",)),
    )(x,
      row(blk["ln1_g"]), row(blk["ln1_b"]),
      blk["qkv_w"].astype(bf16), row(blk["qkv_b"]),
      blk["proj_w"].astype(bf16), row(blk["proj_b"]),
      row(blk["ln2_g"]), row(blk["ln2_b"]),
      blk["fc1_w"].astype(bf16), row(blk["fc1_b"]),
      blk["fc2_w"].astype(bf16), row(blk["fc2_b"]))


def projection_heads(feats, params):
    """feats: (B, S_PAD, D) f32 -> (patch_features (B, N, OUT), global_features (B, OUT))."""
    B, s_pad, d = feats.shape
    out = params["pp_w"].shape[1]
    bf16 = jnp.bfloat16
    row = lambda v: v.reshape(1, -1)
    wspec = lambda shape: pl.BlockSpec(shape, lambda b: (0, 0))
    patch_f, glob_f = pl.pallas_call(
        functools.partial(_heads_kernel, n_patches=NUM_PATCHES, vit_eps=1e-6, head_eps=1e-5),
        out_shape=(jax.ShapeDtypeStruct((B, NUM_PATCHES, out), jnp.float32),
                   jax.ShapeDtypeStruct((B, 1, out), jnp.float32)),
        grid=(B,),
        in_specs=[
            pl.BlockSpec((1, s_pad, d), lambda b: (b, 0, 0)),
            wspec((1, d)), wspec((1, d)),                                     # final ViT norm
            wspec((d, out)), wspec((1, out)), wspec((1, out)), wspec((1, out)),  # patch_proj
            wspec((d, out)), wspec((1, out)), wspec((1, out)), wspec((1, out)),  # global_proj
        ],
        out_specs=(pl.BlockSpec((1, NUM_PATCHES, out), lambda b: (b, 0, 0)),
                   pl.BlockSpec((1, 1, out), lambda b: (b, 0, 0))),
        compiler_params=pltpu.CompilerParams(dimension_semantics=("parallel",)),
    )(feats,
      row(params["norm_g"]), row(params["norm_b"]),
      params["pp_w"].astype(bf16), row(params["pp_b"]), row(params["pp_g"]), row(params["pp_beta"]),
      params["gp_w"].astype(bf16), row(params["gp_b"]), row(params["gp_g"]), row(params["gp_beta"]))
    return patch_f, glob_f[:, 0, :]


# ----------------------------- params -----------------------------

def init_params(key):
    ks = iter(jax.random.split(key, 64))
    std = 0.02

    def w(shape):
        return std * jax.random.normal(next(ks), shape, jnp.float32)

    params = {
        "patch_w": w((PATCH_K, HIDDEN)),
        "patch_b": jnp.zeros((HIDDEN,), jnp.float32),
        "cls": w((1, HIDDEN)),
        "pos": w((SEQ, HIDDEN)),
        "norm_g": jnp.ones((HIDDEN,), jnp.float32),
        "norm_b": jnp.zeros((HIDDEN,), jnp.float32),
        "blocks": [],
        # projection heads: Linear -> LayerNorm -> Dropout(identity at inference)
        "pp_w": w((HIDDEN, OUTPUT_DIM)), "pp_b": jnp.zeros((OUTPUT_DIM,), jnp.float32),
        "pp_g": jnp.ones((OUTPUT_DIM,), jnp.float32), "pp_beta": jnp.zeros((OUTPUT_DIM,), jnp.float32),
        "gp_w": w((HIDDEN, OUTPUT_DIM)), "gp_b": jnp.zeros((OUTPUT_DIM,), jnp.float32),
        "gp_g": jnp.ones((OUTPUT_DIM,), jnp.float32), "gp_beta": jnp.zeros((OUTPUT_DIM,), jnp.float32),
    }
    for _ in range(DEPTH):
        params["blocks"].append({
            "ln1_g": jnp.ones((HIDDEN,), jnp.float32), "ln1_b": jnp.zeros((HIDDEN,), jnp.float32),
            "qkv_w": w((HIDDEN, 3 * HIDDEN)), "qkv_b": jnp.zeros((3 * HIDDEN,), jnp.float32),
            "proj_w": w((HIDDEN, HIDDEN)), "proj_b": jnp.zeros((HIDDEN,), jnp.float32),
            "ln2_g": jnp.ones((HIDDEN,), jnp.float32), "ln2_b": jnp.zeros((HIDDEN,), jnp.float32),
            "fc1_w": w((HIDDEN, MLP_DIM)), "fc1_b": jnp.zeros((MLP_DIM,), jnp.float32),
            "fc2_w": w((MLP_DIM, HIDDEN)), "fc2_b": jnp.zeros((HIDDEN,), jnp.float32),
        })
    return params


# ----------------------------- forward pass -----------------------------

def vit_forward_features(params, images):
    """images: (B, 3, H, W) NCHW -> padded token features (B, S_PAD, HIDDEN), final LN deferred."""
    B, C, H, W = images.shape
    gh, gw = H // PATCH, W // PATCH
    N = gh * gw

    # patchify glue: NCHW -> (B*N, C*P*P); zero-pad contraction dim 48 -> 64
    x = images.reshape(B, C, gh, PATCH, gw, PATCH)
    x = x.transpose(0, 2, 4, 1, 3, 5).reshape(B * N, C * PATCH * PATCH)
    x = jnp.pad(x, ((0, 0), (0, PATCH_K_PAD - PATCH_K)))
    w_pad = jnp.pad(params["patch_w"], ((0, PATCH_K_PAD - PATCH_K), (0, 0))).astype(jnp.bfloat16)
    x = patch_embed(x, w_pad, params["patch_b"]).reshape(B, N, HIDDEN)

    # token assembly (tiny XLA glue): prepend CLS, add positional embedding, pad 17 -> 24.
    # Pad tokens are zero and are masked out of attention inside the block kernel.
    cls = jnp.broadcast_to(params["cls"].reshape(1, 1, HIDDEN), (B, 1, HIDDEN))
    tok = jnp.concatenate([cls, x], axis=1) + params["pos"].reshape(1, SEQ, HIDDEN)
    tok = jnp.pad(tok, ((0, 0), (0, S_PAD - SEQ), (0, 0)))               # (B, S_PAD, D)

    for blk in params["blocks"]:
        tok = transformer_block(tok, blk)
    return tok                        # final ViT LayerNorm is fused into the heads kernel


@jax.jit
def vision_encoder_forward(params, images):
    """Matches VisionEncoder.forward: returns (patch_features, global_features)."""
    feats = vit_forward_features(params, images)                         # (B, S_PAD, D)
    patch_features, global_features = projection_heads(feats, params)
    return patch_features, global_features


# ----------------------------- main -----------------------------

if __name__ == "__main__":
    key = jax.random.PRNGKey(0)
    pkey, xkey = jax.random.split(key)
    params = init_params(pkey)

    B = 2
    images = jax.random.normal(xkey, (B, IN_CH, IMG, IMG), jnp.float32)  # NCHW like PyTorch

    patch_feats, global_feats = vision_encoder_forward(params, images)
    jax.block_until_ready((patch_feats, global_feats))

    assert patch_feats.shape == (B, NUM_PATCHES, OUTPUT_DIM), patch_feats.shape
    assert global_feats.shape == (B, OUTPUT_DIM), global_feats.shape
    assert bool(jnp.all(jnp.isfinite(patch_feats))) and bool(jnp.all(jnp.isfinite(global_feats)))

    print("KERNEL_OK")
</pallas_src>

<mosaic_0001>
module attributes {stable_mosaic.version = 11 : i64} {
  func.func @_patch_embed_kernel(%arg0: i32, %arg1: memref<32x64xf32, #tpu.memory_space<vmem>>, %arg2: memref<64x128xbf16, #tpu.memory_space<vmem>>, %arg3: memref<1x128xf32, #tpu.memory_space<vmem>>, %arg4: memref<32x128xf32, #tpu.memory_space<vmem>>) attributes {dimension_semantics = [#tpu.dimension_semantics<arbitrary>], iteration_bounds = array<i64: 1>, scalar_prefetch = 0 : i64, scratch_operands = 0 : i64, tpu.core_type = #tpu.core_type<tc>, window_params = [{pipeline_mode = #tpu.pipeline_mode<synchronous>, transform_indices = @transform_0, window_bounds = array<i64: 32, 64>}, {pipeline_mode = #tpu.pipeline_mode<synchronous>, transform_indices = @transform_1, window_bounds = array<i64: 64, 128>}, {pipeline_mode = #tpu.pipeline_mode<synchronous>, transform_indices = @transform_2, window_bounds = array<i64: 1, 128>}, {pipeline_mode = #tpu.pipeline_mode<synchronous>, transform_indices = @transform_3, window_bounds = array<i64: 32, 128>}]} {
    %c0 = arith.constant 0 : index
    %c0_0 = arith.constant 0 : index
    %0 = vector.load %arg1[%c0, %c0_0] : memref<32x64xf32, #tpu.memory_space<vmem>>, vector<32x64xf32>
    %1 = arith.truncf %0 : vector<32x64xf32> to vector<32x64xbf16>
    %c0_1 = arith.constant 0 : index
    %c0_2 = arith.constant 0 : index
    %2 = vector.load %arg2[%c0_1, %c0_2] : memref<64x128xbf16, #tpu.memory_space<vmem>>, vector<64x128xbf16>
    %cst = arith.constant dense<0.000000e+00> : vector<32x128xf32>
    %3 = tpu.matmul %1, %2, %cst {dimension_numbers = #tpu.dot_dimension_numbers<[1], [0], [0], [1], [0, 0, 1, 1], [], []>} : vector<32x64xbf16>, vector<64x128xbf16>, vector<32x128xf32> -> vector<32x128xf32>
    %c0_3 = arith.constant 0 : index
    %c0_4 = arith.constant 0 : index
    %4 = vector.load %arg3[%c0_3, %c0_4] : memref<1x128xf32, #tpu.memory_space<vmem>>, vector<1x128xf32>
    %5 = vector.broadcast %4 : vector<1x128xf32> to vector<32x128xf32>
    %6 = arith.addf %3, %5 : vector<32x128xf32>
    %c0_5 = arith.constant 0 : index
    %c0_6 = arith.constant 0 : index
    %7 = vector.load %arg4[%c0_5, %c0_6] : memref<32x128xf32, #tpu.memory_space<vmem>>, vector<32x128xf32>
    tpu.vector_store %arg4[%c0_5, %c0_6], %6 {strides = array<i32>} : memref<32x128xf32, #tpu.memory_space<vmem>>, vector<32x128xf32>,
    return
  }
  func.func @transform_0(%arg0: i32) -> (i32, i32) {
    %c0_i32 = arith.constant 0 : i32
    %c0_i32_0 = arith.constant 0 : i32
    %c0_i32_1 = arith.constant 0 : i32
    return %c0_i32, %c0_i32_0 : i32, i32
  }
  func.func @transform_1(%arg0: i32) -> (i32, i32) {
    %c0_i32 = arith.constant 0 : i32
    %c0_i32_0 = arith.constant 0 : i32
    %c0_i32_1 = arith.constant 0 : i32
    return %c0_i32, %c0_i32_0 : i32, i32
  }
  func.func @transform_2(%arg0: i32) -> (i32, i32) {
    %c0_i32 = arith.constant 0 : i32
    %c0_i32_0 = arith.constant 0 : i32
    %c0_i32_1 = arith.constant 0 : i32
    return %c0_i32, %c0_i32_0 : i32, i32
  }
  func.func @transform_3(%arg0: i32) -> (i32, i32) {
    %c0_i32 = arith.constant 0 : i32
    %c0_i32_0 = arith.constant 0 : i32
    %c0_i32_1 = arith.constant 0 : i32
    return %c0_i32, %c0_i32_0 : i32, i32
  }
}

module attributes {stable_mosaic.version = 11 : i64} {
  func.func @_heads_kernel(%arg0: i32, %arg1: memref<1x24x128xf32, #tpu.memory_space<vmem>>, %arg2: memref<1x128xf32, #tpu.memory_space<vmem>>, %arg3: memref<1x128xf32, #tpu.memory_space<vmem>>, %arg4: memref<128x128xbf16, #tpu.memory_space<vmem>>, %arg5: memref<1x128xf32, #tpu.memory_space<vmem>>, %arg6: memref<1x128xf32, #tpu.memory_space<vmem>>, %arg7: memref<1x128xf32, #tpu.memory_space<vmem>>, %arg8: memref<128x128xbf16, #tpu.memory_space<vmem>>, %arg9: memref<1x128xf32, #tpu.memory_space<vmem>>, %arg10: memref<1x128xf32, #tpu.memory_space<vmem>>, %arg11: memref<1x128xf32, #tpu.memory_space<vmem>>, %arg12: memref<1x16x128xf32, #tpu.memory_space<vmem>>, %arg13: memref<1x1x128xf32, #tpu.memory_space<vmem>>) attributes {dimension_semantics = [#tpu.dimension_semantics<parallel>], iteration_bounds = array<i64: 2>, scalar_prefetch = 0 : i64, scratch_operands = 0 : i64, tpu.core_type = #tpu.core_type<tc>, window_params = [{transform_indices = @transform_0, window_bounds = array<i64: 1, 24, 128>}, {pipeline_mode = #tpu.pipeline_mode<synchronous>, transform_indices = @transform_1, window_bounds = array<i64: 1, 128>}, {pipeline_mode = #tpu.pipeline_mode<synchronous>, transform_indices = @transform_2, window_bounds = array<i64: 1, 128>}, {pipeline_mode = #tpu.pipeline_mode<synchronous>, transform_indices = @transform_3, window_bounds = array<i64: 128, 128>}, {pipeline_mode = #tpu.pipeline_mode<synchronous>, transform_indices = @transform_4, window_bounds = array<i64: 1, 128>}, {pipeline_mode = #tpu.pipeline_mode<synchronous>, transform_indices = @transform_5, window_bounds = array<i64: 1, 128>}, {pipeline_mode = #tpu.pipeline_mode<synchronous>, transform_indices = @transform_6, window_bounds = array<i64: 1, 128>}, {pipeline_mode = #tpu.pipeline_mode<synchronous>, transform_indices = @transform_7, window_bounds = array<i64: 128, 128>}, {pipeline_mode = #tpu.pipeline_mode<synchronous>, transform_indices = @transform_8, window_bounds = array<i64: 1, 128>}, {pipeline_mode = #tpu.pipeline_mode<synchronous>, transform_indices = @transform_9, window_bounds = array<i64: 1, 128>}, {pipeline_mode = #tpu.pipeline_mode<synchronous>, transform_indices = @transform_10, window_bounds = array<i64: 1, 128>}, {transform_indices = @transform_11, window_bounds = array<i64: 1, 16, 128>}, {transform_indices = @transform_12, window_bounds = array<i64: 1, 1, 128>}]} {
    %c0 = arith.constant 0 : index
    %c0_0 = arith.constant 0 : index
    %c0_1 = arith.constant 0 : index
    %0 = vector.load %arg1[%c0, %c0_0, %c0_1] : memref<1x24x128xf32, #tpu.memory_space<vmem>>, vector<1x24x128xf32>
    %1 = vector.shape_cast %0 : vector<1x24x128xf32> to vector<24x128xf32>
    %c0_2 = arith.constant 0 : index
    %c0_3 = arith.constant 0 : index
    %2 = vector.load %arg2[%c0_2, %c0_3] : memref<1x128xf32, #tpu.memory_space<vmem>>, vector<1x128xf32>
    %c0_4 = arith.constant 0 : index
    %c0_5 = arith.constant 0 : index
    %3 = vector.load %arg3[%c0_4, %c0_5] : memref<1x128xf32, #tpu.memory_space<vmem>>, vector<1x128xf32>
    %cst = arith.constant dense<0.000000e+00> : vector<24xf32>
    %4 = vector.multi_reduction <add>, %1, %cst [1] : vector<24x128xf32> to vector<24xf32>
    %5 = vector.shape_cast %4 : vector<24xf32> to vector<24x1xf32>
    %cst_6 = arith.constant 1.280000e+02 : f32
    %6 = vector.broadcast %cst_6 : f32 to vector<24x1xf32>
    %7 = arith.divf %5, %6 : vector<24x1xf32>
    %8 = vector.broadcast %7 : vector<24x1xf32> to vector<24x128xf32>
    %9 = arith.subf %1, %8 : vector<24x128xf32>
    %10 = arith.mulf %9, %9 : vector<24x128xf32>
    %cst_7 = arith.constant dense<0.000000e+00> : vector<24xf32>
    %11 = vector.multi_reduction <add>, %10, %cst_7 [1] : vector<24x128xf32> to vector<24xf32>
    %12 = vector.shape_cast %11 : vector<24xf32> to vector<24x1xf32>
    %cst_8 = arith.constant 1.280000e+02 : f32
    %13 = vector.broadcast %cst_8 : f32 to vector<24x1xf32>
    %14 = arith.divf %12, %13 : vector<24x1xf32>
    %15 = vector.broadcast %7 : vector<24x1xf32> to vector<24x128xf32>
    %16 = arith.subf %1, %15 : vector<24x128xf32>
    %cst_9 = arith.constant 9.99999997E-7 : f32
    %17 = vector.broadcast %cst_9 : f32 to vector<24x1xf32>
    %18 = arith.addf %14, %17 : vector<24x1xf32>
    %19 = math.rsqrt %18 : vector<24x1xf32>
    %20 = vector.broadcast %19 : vector<24x1xf32> to vector<24x128xf32>
    %21 = arith.mulf %16, %20 : vector<24x128xf32>
    %22 = vector.broadcast %2 : vector<1x128xf32> to vector<24x128xf32>
    %23 = arith.mulf %21, %22 : vector<24x128xf32>
    %24 = vector.broadcast %3 : vector<1x128xf32> to vector<24x128xf32>
    %25 = arith.addf %23, %24 : vector<24x128xf32>
    %26 = vector.extract_strided_slice %25 {offsets = [1, 0], sizes = [16, 128], strides = [1, 1]} : vector<24x128xf32> to vector<16x128xf32>
    %27 = arith.truncf %26 : vector<16x128xf32> to vector<16x128xbf16>
    %c0_10 = arith.constant 0 : index
    %c0_11 = arith.constant 0 : index
    %28 = vector.load %arg4[%c0_10, %c0_11] : memref<128x128xbf16, #tpu.memory_space<vmem>>, vector<128x128xbf16>
    %cst_12 = arith.constant dense<0.000000e+00> : vector<16x128xf32>
    %29 = tpu.matmul %27, %28, %cst_12 {dimension_numbers = #tpu.dot_dimension_numbers<[1], [0], [0], [1], [0, 0, 1, 1], [], []>} : vector<16x128xbf16>, vector<128x128xbf16>, vector<16x128xf32> -> vector<16x128xf32>
    %c0_13 = arith.constant 0 : index
    %c0_14 = arith.constant 0 : index
    %30 = vector.load %arg5[%c0_13, %c0_14] : memref<1x128xf32, #tpu.memory_space<vmem>>, vector<1x128xf32>
    %31 = vector.broadcast %30 : vector<1x128xf32> to vector<16x128xf32>
    %32 = arith.addf %29, %31 : vector<16x128xf32>
    %c0_15 = arith.constant 0 : index
    %c0_16 = arith.constant 0 : index
    %33 = vector.load %arg6[%c0_15, %c0_16] : memref<1x128xf32, #tpu.memory_space<vmem>>, vector<1x128xf32>
    %c0_17 = arith.constant 0 : index
    %c0_18 = arith.constant 0 : index
    %34 = vector.load %arg7[%c0_17, %c0_18] : memref<1x128xf32, #tpu.memory_space<vmem>>, vector<1x128xf32>
    %cst_19 = arith.constant dense<0.000000e+00> : vector<16xf32>
    %35 = vector.multi_reduction <add>, %32, %cst_19 [1] : vector<16x128xf32> to vector<16xf32>
    %36 = vector.shape_cast %35 : vector<16xf32> to vector<16x1xf32>
    %cst_20 = arith.constant 1.280000e+02 : f32
    %37 = vector.broadcast %cst_20 : f32 to vector<16x1xf32>
    %38 = arith.divf %36, %37 : vector<16x1xf32>
    %39 = vector.broadcast %38 : vector<16x1xf32> to vector<16x128xf32>
    %40 = arith.subf %32, %39 : vector<16x128xf32>
    %41 = arith.mulf %40, %40 : vector<16x128xf32>
    %cst_21 = arith.constant dense<0.000000e+00> : vector<16xf32>
    %42 = vector.multi_reduction <add>, %41, %cst_21 [1] : vector<16x128xf32> to vector<16xf32>
    %43 = vector.shape_cast %42 : vector<16xf32> to vector<16x1xf32>
    %cst_22 = arith.constant 1.280000e+02 : f32
    %44 = vector.broadcast %cst_22 : f32 to vector<16x1xf32>
    %45 = arith.divf %43, %44 : vector<16x1xf32>
    %46 = vector.broadcast %38 : vector<16x1xf32> to vector<16x128xf32>
    %47 = arith.subf %32, %46 : vector<16x128xf32>
    %cst_23 = arith.constant 9.99999974E-6 : f32
    %48 = vector.broadcast %cst_23 : f32 to vector<16x1xf32>
    %49 = arith.addf %45, %48 : vector<16x1xf32>
    %50 = math.rsqrt %49 : vector<16x1xf32>
    %51 = vector.broadcast %50 : vector<16x1xf32> to vector<16x128xf32>
    %52 = arith.mulf %47, %51 : vector<16x128xf32>
    %53 = vector.broadcast %33 : vector<1x128xf32> to vector<16x128xf32>
    %54 = arith.mulf %52, %53 : vector<16x128xf32>
    %55 = vector.broadcast %34 : vector<1x128xf32> to vector<16x128xf32>
    %56 = arith.addf %54, %55 : vector<16x128xf32>
    %c0_24 = arith.constant 0 : index
    %c0_25 = arith.constant 0 : index
    %c0_26 = arith.constant 0 : index
    %57 = vector.load %arg12[%c0_24, %c0_25, %c0_26] : memref<1x16x128xf32, #tpu.memory_space<vmem>>, vector<1x16x128xf32>
    %58 = vector.shape_cast %57 : vector<1x16x128xf32> to vector<16x128xf32>
    %59 = vector.shape_cast %56 : vector<16x128xf32> to vector<1x16x128xf32>
    tpu.vector_store %arg12[%c0_24, %c0_25, %c0_26], %59 {strides = array<i32>} : memref<1x16x128xf32, #tpu.memory_space<vmem>>, vector<1x16x128xf32>,
    %60 = vector.extract_strided_slice %25 {offsets = [0, 0], sizes = [1, 128], strides = [1, 1]} : vector<24x128xf32> to vector<1x128xf32>
    %61 = arith.truncf %60 : vector<1x128xf32> to vector<1x128xbf16>
    %c0_27 = arith.constant 0 : index
    %c0_28 = arith.constant 0 : index
    %62 = vector.load %arg8[%c0_27, %c0_28] : memref<128x128xbf16, #tpu.memory_space<vmem>>, vector<128x128xbf16>
    %cst_29 = arith.constant dense<0.000000e+00> : vector<1x128xf32>
    %63 = tpu.matmul %61, %62, %cst_29 {dimension_numbers = #tpu.dot_dimension_numbers<[1], [0], [0], [1], [0, 0, 1, 1], [], []>} : vector<1x128xbf16>, vector<128x128xbf16>, vector<1x128xf32> -> vector<1x128xf32>
    %c0_30 = arith.constant 0 : index
    %c0_31 = arith.constant 0 : index
    %64 = vector.load %arg9[%c0_30, %c0_31] : memref<1x128xf32, #tpu.memory_space<vmem>>, vector<1x128xf32>
    %65 = arith.addf %63, %64 : vector<1x128xf32>
    %c0_32 = arith.constant 0 : index
    %c0_33 = arith.constant 0 : index
    %66 = vector.load %arg10[%c0_32, %c0_33] : memref<1x128xf32, #tpu.memory_space<vmem>>, vector<1x128xf32>
    %c0_34 = arith.constant 0 : index
    %c0_35 = arith.constant 0 : index
    %67 = vector.load %arg11[%c0_34, %c0_35] : memref<1x128xf32, #tpu.memory_space<vmem>>, vector<1x128xf32>
    %cst_36 = arith.constant dense<0.000000e+00> : vector<1xf32>
    %68 = vector.multi_reduction <add>, %65, %cst_36 [1] : vector<1x128xf32> to vector<1xf32>
    %69 = vector.shape_cast %68 : vector<1xf32> to vector<1x1xf32>
    %cst_37 = arith.constant 1.280000e+02 : f32
    %70 = vector.broadcast %cst_37 : f32 to vector<1x1xf32>
    %71 = arith.divf %69, %70 : vector<1x1xf32>
    %72 = vector.broadcast %71 : vector<1x1xf32> to vector<1x128xf32>
    %73 = arith.subf %65, %72 : vector<1x128xf32>
    %74 = arith.mulf %73, %73 : vector<1x128xf32>
    %cst_38 = arith.constant dense<0.000000e+00> : vector<1xf32>
    %75 = vector.multi_reduction <add>, %74, %cst_38 [1] : vector<1x128xf32> to vector<1xf32>
    %76 = vector.shape_cast %75 : vector<1xf32> to vector<1x1xf32>
    %cst_39 = arith.constant 1.280000e+02 : f32
    %77 = vector.broadcast %cst_39 : f32 to vector<1x1xf32>
    %78 = arith.divf %76, %77 : vector<1x1xf32>
    %79 = vector.broadcast %71 : vector<1x1xf32> to vector<1x128xf32>
    %80 = arith.subf %65, %79 : vector<1x128xf32>
    %cst_40 = arith.constant 9.99999974E-6 : f32
    %81 = vector.broadcast %cst_40 : f32 to vector<1x1xf32>
    %82 = arith.addf %78, %81 : vector<1x1xf32>
    %83 = math.rsqrt %82 : vector<1x1xf32>
    %84 = vector.broadcast %83 : vector<1x1xf32> to vector<1x128xf32>
    %85 = arith.mulf %80, %84 : vector<1x128xf32>
    %86 = arith.mulf %85, %66 : vector<1x128xf32>
    %87 = arith.addf %86, %67 : vector<1x128xf32>
    %c0_41 = arith.constant 0 : index
    %c0_42 = arith.constant 0 : index
    %c0_43 = arith.constant 0 : index
    %88 = vector.load %arg13[%c0_41, %c0_42, %c0_43] : memref<1x1x128xf32, #tpu.memory_space<vmem>>, vector<1x1x128xf32>
    %89 = vector.shape_cast %88 : vector<1x1x128xf32> to vector<1x128xf32>
    %90 = vector.shape_cast %87 : vector<1x128xf32> to vector<1x1x128xf32>
    tpu.vector_store %arg13[%c0_41, %c0_42, %c0_43], %90 {strides = array<i32>} : memref<1x1x128xf32, #tpu.memory_space<vmem>>, vector<1x1x128xf32>,
    return
  }
  func.func @transform_0(%arg0: i32) -> (i32, i32, i32) {
    %c0_i32 = arith.constant 0 : i32
    %c0_i32_0 = arith.constant 0 : i32
    %c0_i32_1 = arith.constant 0 : i32
    return %arg0, %c0_i32, %c0_i32_0 : i32, i32, i32
  }
  func.func @transform_1(%arg0: i32) -> (i32, i32) {
    %c0_i32 = arith.constant 0 : i32
    %c0_i32_0 = arith.constant 0 : i32
    %c0_i32_1 = arith.constant 0 : i32
    return %c0_i32, %c0_i32_0 : i32, i32
  }
  func.func @transform_2(%arg0: i32) -> (i32, i32) {
    %c0_i32 = arith.constant 0 : i32
    %c0_i32_0 = arith.constant 0 : i32
    %c0_i32_1 = arith.constant 0 : i32
    return %c0_i32, %c0_i32_0 : i32, i32
  }
  func.func @transform_3(%arg0: i32) -> (i32, i32) {
    %c0_i32 = arith.constant 0 : i32
    %c0_i32_0 = arith.constant 0 : i32
    %c0_i32_1 = arith.constant 0 : i32
    return %c0_i32, %c0_i32_0 : i32, i32
  }
  func.func @transform_4(%arg0: i32) -> (i32, i32) {
    %c0_i32 = arith.constant 0 : i32
    %c0_i32_0 = arith.constant 0 : i32
    %c0_i32_1 = arith.constant 0 : i32
    return %c0_i32, %c0_i32_0 : i32, i32
  }
  func.func @transform_5(%arg0: i32) -> (i32, i32) {
    %c0_i32 = arith.constant 0 : i32
    %c0_i32_0 = arith.constant 0 : i32
    %c0_i32_1 = arith.constant 0 : i32
    return %c0_i32, %c0_i32_0 : i32, i32
  }
  func.func @transform_6(%arg0: i32) -> (i32, i32) {
    %c0_i32 = arith.constant 0 : i32
    %c0_i32_0 = arith.constant 0 : i32
    %c0_i32_1 = arith.constant 0 : i32
    return %c0_i32, %c0_i32_0 : i32, i32
  }
  func.func @transform_7(%arg0: i32) -> (i32, i32) {
    %c0_i32 = arith.constant 0 : i32
    %c0_i32_0 = arith.constant 0 : i32
    %c0_i32_1 = arith.constant 0 : i32
    return %c0_i32, %c0_i32_0 : i32, i32
  }
  func.func @transform_8(%arg0: i32) -> (i32, i32) {
    %c0_i32 = arith.constant 0 : i32
    %c0_i32_0 = arith.constant 0 : i32
    %c0_i32_1 = arith.constant 0 : i32
    return %c0_i32, %c0_i32_0 : i32, i32
  }
  func.func @transform_9(%arg0: i32) -> (i32, i32) {
    %c0_i32 = arith.constant 0 : i32
    %c0_i32_0 = arith.constant 0 : i32
    %c0_i32_1 = arith.constant 0 : i32
    return %c0_i32, %c0_i32_0 : i32, i32
  }
  func.func @transform_10(%arg0: i32) -> (i32, i32) {
    %c0_i32 = arith.constant 0 : i32
    %c0_i32_0 = arith.constant 0 : i32
    %c0_i32_1 = arith.constant 0 : i32
    return %c0_i32, %c0_i32_0 : i32, i32
  }
  func.func @transform_11(%arg0: i32) -> (i32, i32, i32) {
    %c0_i32 = arith.constant 0 : i32
    %c0_i32_0 = arith.constant 0 : i32
    %c0_i32_1 = arith.constant 0 : i32
    return %arg0, %c0_i32, %c0_i32_0 : i32, i32, i32
  }
  func.func @transform_12(%arg0: i32) -> (i32, i32, i32) {
    %c0_i32 = arith.constant 0 : i32
    %c0_i32_0 = arith.constant 0 : i32
    %c0_i32_1 = arith.constant 0 : i32
    return %arg0, %c0_i32, %c0_i32_0 : i32, i32, i32
  }
}

module attributes {stable_mosaic.version = 11 : i64} {
  func.func @_block_kernel(%arg0: i32, %arg1: memref<1x24x128xf32, #tpu.memory_space<vmem>>, %arg2: memref<1x128xf32, #tpu.memory_space<vmem>>, %arg3: memref<1x128xf32, #tpu.memory_space<vmem>>, %arg4: memref<128x384xbf16, #tpu.memory_space<vmem>>, %arg5: memref<1x384xf32, #tpu.memory_space<vmem>>, %arg6: memref<128x128xbf16, #tpu.memory_space<vmem>>, %arg7: memref<1x128xf32, #tpu.memory_space<vmem>>, %arg8: memref<1x128xf32, #tpu.memory_space<vmem>>, %arg9: memref<1x128xf32, #tpu.memory_space<vmem>>, %arg10: memref<128x512xbf16, #tpu.memory_space<vmem>>, %arg11: memref<1x512xf32, #tpu.memory_space<vmem>>, %arg12: memref<512x128xbf16, #tpu.memory_space<vmem>>, %arg13: memref<1x128xf32, #tpu.memory_space<vmem>>, %arg14: memref<1x24x128xf32, #tpu.memory_space<vmem>>) attributes {dimension_semantics = [#tpu.dimension_semantics<parallel>], iteration_bounds = array<i64: 2>, scalar_prefetch = 0 : i64, scratch_operands = 0 : i64, tpu.core_type = #tpu.core_type<tc>, window_params = [{transform_indices = @transform_0, window_bounds = array<i64: 1, 24, 128>}, {pipeline_mode = #tpu.pipeline_mode<synchronous>, transform_indices = @transform_1, window_bounds = array<i64: 1, 128>}, {pipeline_mode = #tpu.pipeline_mode<synchronous>, transform_indices = @transform_2, window_bounds = array<i64: 1, 128>}, {pipeline_mode = #tpu.pipeline_mode<synchronous>, transform_indices = @transform_3, window_bounds = array<i64: 128, 384>}, {pipeline_mode = #tpu.pipeline_mode<synchronous>, transform_indices = @transform_4, window_bounds = array<i64: 1, 384>}, {pipeline_mode = #tpu.pipeline_mode<synchronous>, transform_indices = @transform_5, window_bounds = array<i64: 128, 128>}, {pipeline_mode = #tpu.pipeline_mode<synchronous>, transform_indices = @transform_6, window_bounds = array<i64: 1, 128>}, {pipeline_mode = #tpu.pipeline_mode<synchronous>, transform_indices = @transform_7, window_bounds = array<i64: 1, 128>}, {pipeline_mode = #tpu.pipeline_mode<synchronous>, transform_indices = @transform_8, window_bounds = array<i64: 1, 128>}, {pipeline_mode = #tpu.pipeline_mode<synchronous>, transform_indices = @transform_9, window_bounds = array<i64: 128, 512>}, {pipeline_mode = #tpu.pipeline_mode<synchronous>, transform_indices = @transform_10, window_bounds = array<i64: 1, 512>}, {pipeline_mode = #tpu.pipeline_mode<synchronous>, transform_indices = @transform_11, window_bounds = array<i64: 512, 128>}, {pipeline_mode = #tpu.pipeline_mode<synchronous>, transform_indices = @transform_12, window_bounds = array<i64: 1, 128>}, {transform_indices = @transform_13, window_bounds = array<i64: 1, 24, 128>}]} {
    %c0 = arith.constant 0 : index
    %c0_0 = arith.constant 0 : index
    %c0_1 = arith.constant 0 : index
    %0 = vector.load %arg1[%c0, %c0_0, %c0_1] : memref<1x24x128xf32, #tpu.memory_space<vmem>>, vector<1x24x128xf32>
    %1 = vector.shape_cast %0 : vector<1x24x128xf32> to vector<24x128xf32>
    %c0_2 = arith.constant 0 : index
    %c0_3 = arith.constant 0 : index
    %2 = vector.load %arg2[%c0_2, %c0_3] : memref<1x128xf32, #tpu.memory_space<vmem>>, vector<1x128xf32>
    %c0_4 = arith.constant 0 : index
    %c0_5 = arith.constant 0 : index
    %3 = vector.load %arg3[%c0_4, %c0_5] : memref<1x128xf32, #tpu.memory_space<vmem>>, vector<1x128xf32>
    %cst = arith.constant dense<0.000000e+00> : vector<24xf32>
    %4 = vector.multi_reduction <add>, %1, %cst [1] : vector<24x128xf32> to vector<24xf32>
    %5 = vector.shape_cast %4 : vector<24xf32> to vector<24x1xf32>
    %cst_6 = arith.constant 1.280000e+02 : f32
    %6 = vector.broadcast %cst_6 : f32 to vector<24x1xf32>
    %7 = arith.divf %5, %6 : vector<24x1xf32>
    %8 = vector.broadcast %7 : vector<24x1xf32> to vector<24x128xf32>
    %9 = arith.subf %1, %8 : vector<24x128xf32>
    %10 = arith.mulf %9, %9 : vector<24x128xf32>
    %cst_7 = arith.constant dense<0.000000e+00> : vector<24xf32>
    %11 = vector.multi_reduction <add>, %10, %cst_7 [1] : vector<24x128xf32> to vector<24xf32>
    %12 = vector.shape_cast %11 : vector<24xf32> to vector<24x1xf32>
    %cst_8 = arith.constant 1.280000e+02 : f32
    %13 = vector.broadcast %cst_8 : f32 to vector<24x1xf32>
    %14 = arith.divf %12, %13 : vector<24x1xf32>
    %15 = vector.broadcast %7 : vector<24x1xf32> to vector<24x128xf32>
    %16 = arith.subf %1, %15 : vector<24x128xf32>
    %cst_9 = arith.constant 9.99999997E-7 : f32
    %17 = vector.broadcast %cst_9 : f32 to vector<24x1xf32>
    %18 = arith.addf %14, %17 : vector<24x1xf32>
    %19 = math.rsqrt %18 : vector<24x1xf32>
    %20 = vector.broadcast %19 : vector<24x1xf32> to vector<24x128xf32>
    %21 = arith.mulf %16, %20 : vector<24x128xf32>
    %22 = vector.broadcast %2 : vector<1x128xf32> to vector<24x128xf32>
    %23 = arith.mulf %21, %22 : vector<24x128xf32>
    %24 = vector.broadcast %3 : vector<1x128xf32> to vector<24x128xf32>
    %25 = arith.addf %23, %24 : vector<24x128xf32>
    %26 = arith.truncf %25 : vector<24x128xf32> to vector<24x128xbf16>
    %c0_10 = arith.constant 0 : index
    %c0_11 = arith.constant 0 : index
    %27 = vector.load %arg4[%c0_10, %c0_11] : memref<128x384xbf16, #tpu.memory_space<vmem>>, vector<128x384xbf16>
    %cst_12 = arith.constant dense<0.000000e+00> : vector<24x384xf32>
    %28 = tpu.matmul %26, %27, %cst_12 {dimension_numbers = #tpu.dot_dimension_numbers<[1], [0], [0], [1], [0, 0, 1, 1], [], []>} : vector<24x128xbf16>, vector<128x384xbf16>, vector<24x384xf32> -> vector<24x384xf32>
    %c0_13 = arith.constant 0 : index
    %c0_14 = arith.constant 0 : index
    %29 = vector.load %arg5[%c0_13, %c0_14] : memref<1x384xf32, #tpu.memory_space<vmem>>, vector<1x384xf32>
    %30 = vector.broadcast %29 : vector<1x384xf32> to vector<24x384xf32>
    %31 = arith.addf %28, %30 : vector<24x384xf32>
    %32 = tpu.iota {dimensions = array<i32: 1>} : vector<24x24xi32>
    %c17_i32 = arith.constant 17 : i32
    %33 = vector.broadcast %c17_i32 : i32 to vector<24x24xi32>
    %34 = arith.cmpi slt, %32, %33 : vector<24x24xi32>
    %cst_15 = arith.constant 0.000000e+00 : f32
    %cst_16 = arith.constant -1.000000e+30 : f32
    %35 = vector.broadcast %cst_15 : f32 to vector<24x24xf32>
    %36 = vector.broadcast %cst_16 : f32 to vector<24x24xf32>
    %37 = arith.select %34, %35, %36 : vector<24x24xi1>, vector<24x24xf32>
    %cst_17 = arith.constant 0.000000e+00 : f32
    %38 = vector.broadcast %cst_17 : f32 to vector<24x128xf32>
    %39 = vector.extract_strided_slice %31 {offsets = [0, 0], sizes = [24, 32], strides = [1, 1]} : vector<24x384xf32> to vector<24x32xf32>
    %40 = arith.truncf %39 : vector<24x32xf32> to vector<24x32xbf16>
    %41 = vector.extract_strided_slice %31 {offsets = [0, 128], sizes = [24, 32], strides = [1, 1]} : vector<24x384xf32> to vector<24x32xf32>
    %42 = arith.truncf %41 : vector<24x32xf32> to vector<24x32xbf16>
    %43 = vector.extract_strided_slice %31 {offsets = [0, 256], sizes = [24, 32], strides = [1, 1]} : vector<24x384xf32> to vector<24x32xf32>
    %44 = arith.truncf %43 : vector<24x32xf32> to vector<24x32xbf16>
    %cst_18 = arith.constant dense<0.000000e+00> : vector<24x24xf32>
    %45 = tpu.matmul %40, %42, %cst_18 {dimension_numbers = #tpu.dot_dimension_numbers<[1], [1], [0], [0], [0, 0, 1, 0], [], []>} : vector<24x32xbf16>, vector<24x32xbf16>, vector<24x24xf32> -> vector<24x24xf32>
    %cst_19 = arith.constant 0.176776692 : f32
    %46 = vector.broadcast %cst_19 : f32 to vector<24x24xf32>
    %47 = arith.mulf %45, %46 : vector<24x24xf32>
    %48 = arith.addf %47, %37 : vector<24x24xf32>
    %cst_20 = arith.constant dense<0xFF800000> : vector<24xf32>
    %49 = vector.multi_reduction <maximumf>, %48, %cst_20 [1] : vector<24x24xf32> to vector<24xf32>
    %50 = vector.shape_cast %49 : vector<24xf32> to vector<24x1xf32>
    %51 = vector.broadcast %50 : vector<24x1xf32> to vector<24x24xf32>
    %52 = arith.subf %48, %51 : vector<24x24xf32>
    %53 = math.exp %52 : vector<24x24xf32>
    %cst_21 = arith.constant dense<0.000000e+00> : vector<24xf32>
    %54 = vector.multi_reduction <add>, %53, %cst_21 [1] : vector<24x24xf32> to vector<24xf32>
    %55 = vector.shape_cast %54 : vector<24xf32> to vector<24x1xf32>
    %56 = tpu.reciprocal %55 {approx = true} : vector<24x1xf32> -> vector<24x1xf32>
    %57 = vector.broadcast %56 : vector<24x1xf32> to vector<24x24xf32>
    %58 = arith.mulf %53, %57 : vector<24x24xf32>
    %59 = arith.truncf %58 : vector<24x24xf32> to vector<24x24xbf16>
    %cst_22 = arith.constant dense<0.000000e+00> : vector<24x32xf32>
    %60 = tpu.matmul %59, %44, %cst_22 {dimension_numbers = #tpu.dot_dimension_numbers<[1], [0], [0], [1], [0, 0, 1, 1], [], []>} : vector<24x24xbf16>, vector<24x32xbf16>, vector<24x32xf32> -> vector<24x32xf32>
    %61 = arith.truncf %60 : vector<24x32xf32> to vector<24x32xbf16>
    %c0_23 = arith.constant 0 : index
    %c0_24 = arith.constant 0 : index
    %62 = vector.load %arg6[%c0_23, %c0_24] : memref<128x128xbf16, #tpu.memory_space<vmem>>, vector<32x128xbf16>
    %cst_25 = arith.constant dense<0.000000e+00> : vector<24x128xf32>
    %63 = tpu.matmul %61, %62, %cst_25 {dimension_numbers = #tpu.dot_dimension_numbers<[1], [0], [0], [1], [0, 0, 1, 1], [], []>} : vector<24x32xbf16>, vector<32x128xbf16>, vector<24x128xf32> -> vector<24x128xf32>
    %64 = arith.addf %38, %63 : vector<24x128xf32>
    %65 = vector.extract_strided_slice %31 {offsets = [0, 32], sizes = [24, 32], strides = [1, 1]} : vector<24x384xf32> to vector<24x32xf32>
    %66 = arith.truncf %65 : vector<24x32xf32> to vector<24x32xbf16>
    %67 = vector.extract_strided_slice %31 {offsets = [0, 160], sizes = [24, 32], strides = [1, 1]} : vector<24x384xf32> to vector<24x32xf32>
    %68 = arith.truncf %67 : vector<24x32xf32> to vector<24x32xbf16>
    %69 = vector.extract_strided_slice %31 {offsets = [0, 288], sizes = [24, 32], strides = [1, 1]} : vector<24x384xf32> to vector<24x32xf32>
    %70 = arith.truncf %69 : vector<24x32xf32> to vector<24x32xbf16>
    %cst_26 = arith.constant dense<0.000000e+00> : vector<24x24xf32>
    %71 = tpu.matmul %66, %68, %cst_26 {dimension_numbers = #tpu.dot_dimension_numbers<[1], [1], [0], [0], [0, 0, 1, 0], [], []>} : vector<24x32xbf16>, vector<24x32xbf16>, vector<24x24xf32> -> vector<24x24xf32>
    %cst_27 = arith.constant 0.176776692 : f32
    %72 = vector.broadcast %cst_27 : f32 to vector<24x24xf32>
    %73 = arith.mulf %71, %72 : vector<24x24xf32>
    %74 = arith.addf %73, %37 : vector<24x24xf32>
    %cst_28 = arith.constant dense<0xFF800000> : vector<24xf32>
    %75 = vector.multi_reduction <maximumf>, %74, %cst_28 [1] : vector<24x24xf32> to vector<24xf32>
    %76 = vector.shape_cast %75 : vector<24xf32> to vector<24x1xf32>
    %77 = vector.broadcast %76 : vector<24x1xf32> to vector<24x24xf32>
    %78 = arith.subf %74, %77 : vector<24x24xf32>
    %79 = math.exp %78 : vector<24x24xf32>
    %cst_29 = arith.constant dense<0.000000e+00> : vector<24xf32>
    %80 = vector.multi_reduction <add>, %79, %cst_29 [1] : vector<24x24xf32> to vector<24xf32>
    %81 = vector.shape_cast %80 : vector<24xf32> to vector<24x1xf32>
    %82 = tpu.reciprocal %81 {approx = true} : vector<24x1xf32> -> vector<24x1xf32>
    %83 = vector.broadcast %82 : vector<24x1xf32> to vector<24x24xf32>
    %84 = arith.mulf %79, %83 : vector<24x24xf32>
    %85 = arith.truncf %84 : vector<24x24xf32> to vector<24x24xbf16>
    %cst_30 = arith.constant dense<0.000000e+00> : vector<24x32xf32>
    %86 = tpu.matmul %85, %70, %cst_30 {dimension_numbers = #tpu.dot_dimension_numbers<[1], [0], [0], [1], [0, 0, 1, 1], [], []>} : vector<24x24xbf16>, vector<24x32xbf16>, vector<24x32xf32> -> vector<24x32xf32>
    %87 = arith.truncf %86 : vector<24x32xf32> to vector<24x32xbf16>
    %c32 = arith.constant 32 : index
    %c0_31 = arith.constant 0 : index
    %88 = vector.load %arg6[%c32, %c0_31] : memref<128x128xbf16, #tpu.memory_space<vmem>>, vector<32x128xbf16>
    %cst_32 = arith.constant dense<0.000000e+00> : vector<24x128xf32>
    %89 = tpu.matmul %87, %88, %cst_32 {dimension_numbers = #tpu.dot_dimension_numbers<[1], [0], [0], [1], [0, 0, 1, 1], [], []>} : vector<24x32xbf16>, vector<32x128xbf16>, vector<24x128xf32> -> vector<24x128xf32>
    %90 = arith.addf %64, %89 : vector<24x128xf32>
    %91 = vector.extract_strided_slice %31 {offsets = [0, 64], sizes = [24, 32], strides = [1, 1]} : vector<24x384xf32> to vector<24x32xf32>
    %92 = arith.truncf %91 : vector<24x32xf32> to vector<24x32xbf16>
    %93 = vector.extract_strided_slice %31 {offsets = [0, 192], sizes = [24, 32], strides = [1, 1]} : vector<24x384xf32> to vector<24x32xf32>
    %94 = arith.truncf %93 : vector<24x32xf32> to vector<24x32xbf16>
    %95 = vector.extract_strided_slice %31 {offsets = [0, 320], sizes = [24, 32], strides = [1, 1]} : vector<24x384xf32> to vector<24x32xf32>
    %96 = arith.truncf %95 : vector<24x32xf32> to vector<24x32xbf16>
    %cst_33 = arith.constant dense<0.000000e+00> : vector<24x24xf32>
    %97 = tpu.matmul %92, %94, %cst_33 {dimension_numbers = #tpu.dot_dimension_numbers<[1], [1], [0], [0], [0, 0, 1, 0], [], []>} : vector<24x32xbf16>, vector<24x32xbf16>, vector<24x24xf32> -> vector<24x24xf32>
    %cst_34 = arith.constant 0.176776692 : f32
    %98 = vector.broadcast %cst_34 : f32 to vector<24x24xf32>
    %99 = arith.mulf %97, %98 : vector<24x24xf32>
    %100 = arith.addf %99, %37 : vector<24x24xf32>
    %cst_35 = arith.constant dense<0xFF800000> : vector<24xf32>
    %101 = vector.multi_reduction <maximumf>, %100, %cst_35 [1] : vector<24x24xf32> to vector<24xf32>
    %102 = vector.shape_cast %101 : vector<24xf32> to vector<24x1xf32>
    %103 = vector.broadcast %102 : vector<24x1xf32> to vector<24x24xf32>
    %104 = arith.subf %100, %103 : vector<24x24xf32>
    %105 = math.exp %104 : vector<24x24xf32>
    %cst_36 = arith.constant dense<0.000000e+00> : vector<24xf32>
    %106 = vector.multi_reduction <add>, %105, %cst_36 [1] : vector<24x24xf32> to vector<24xf32>
    %107 = vector.shape_cast %106 : vector<24xf32> to vector<24x1xf32>
    %108 = tpu.reciprocal %107 {approx = true} : vector<24x1xf32> -> vector<24x1xf32>
    %109 = vector.broadcast %108 : vector<24x1xf32> to vector<24x24xf32>
    %110 = arith.mulf %105, %109 : vector<24x24xf32>
    %111 = arith.truncf %110 : vector<24x24xf32> to vector<24x24xbf16>
    %cst_37 = arith.constant dense<0.000000e+00> : vector<24x32xf32>
    %112 = tpu.matmul %111, %96, %cst_37 {dimension_numbers = #tpu.dot_dimension_numbers<[1], [0], [0], [1], [0, 0, 1, 1], [], []>} : vector<24x24xbf16>, vector<24x32xbf16>, vector<24x32xf32> -> vector<24x32xf32>
    %113 = arith.truncf %112 : vector<24x32xf32> to vector<24x32xbf16>
    %c64 = arith.constant 64 : index
    %c0_38 = arith.constant 0 : index
    %114 = vector.load %arg6[%c64, %c0_38] : memref<128x128xbf16, #tpu.memory_space<vmem>>, vector<32x128xbf16>
    %cst_39 = arith.constant dense<0.000000e+00> : vector<24x128xf32>
    %115 = tpu.matmul %113, %114, %cst_39 {dimension_numbers = #tpu.dot_dimension_numbers<[1], [0], [0], [1], [0, 0, 1, 1], [], []>} : vector<24x32xbf16>, vector<32x128xbf16>, vector<24x128xf32> -> vector<24x128xf32>
    %116 = arith.addf %90, %115 : vector<24x128xf32>
    %117 = vector.extract_strided_slice %31 {offsets = [0, 96], sizes = [24, 32], strides = [1, 1]} : vector<24x384xf32> to vector<24x32xf32>
    %118 = arith.truncf %117 : vector<24x32xf32> to vector<24x32xbf16>
    %119 = vector.extract_strided_slice %31 {offsets = [0, 224], sizes = [24, 32], strides = [1, 1]} : vector<24x384xf32> to vector<24x32xf32>
    %120 = arith.truncf %119 : vector<24x32xf32> to vector<24x32xbf16>
    %121 = vector.extract_strided_slice %31 {offsets = [0, 352], sizes = [24, 32], strides = [1, 1]} : vector<24x384xf32> to vector<24x32xf32>
    %122 = arith.truncf %121 : vector<24x32xf32> to vector<24x32xbf16>
    %cst_40 = arith.constant dense<0.000000e+00> : vector<24x24xf32>
    %123 = tpu.matmul %118, %120, %cst_40 {dimension_numbers = #tpu.dot_dimension_numbers<[1], [1], [0], [0], [0, 0, 1, 0], [], []>} : vector<24x32xbf16>, vector<24x32xbf16>, vector<24x24xf32> -> vector<24x24xf32>
    %cst_41 = arith.constant 0.176776692 : f32
    %124 = vector.broadcast %cst_41 : f32 to vector<24x24xf32>
    %125 = arith.mulf %123, %124 : vector<24x24xf32>
    %126 = arith.addf %125, %37 : vector<24x24xf32>
    %cst_42 = arith.constant dense<0xFF800000> : vector<24xf32>
    %127 = vector.multi_reduction <maximumf>, %126, %cst_42 [1] : vector<24x24xf32> to vector<24xf32>
    %128 = vector.shape_cast %127 : vector<24xf32> to vector<24x1xf32>
    %129 = vector.broadcast %128 : vector<24x1xf32> to vector<24x24xf32>
    %130 = arith.subf %126, %129 : vector<24x24xf32>
    %131 = math.exp %130 : vector<24x24xf32>
    %cst_43 = arith.constant dense<0.000000e+00> : vector<24xf32>
    %132 = vector.multi_reduction <add>, %131, %cst_43 [1] : vector<24x24xf32> to vector<24xf32>
    %133 = vector.shape_cast %132 : vector<24xf32> to vector<24x1xf32>
    %134 = tpu.reciprocal %133 {approx = true} : vector<24x1xf32> -> vector<24x1xf32>
    %135 = vector.broadcast %134 : vector<24x1xf32> to vector<24x24xf32>
    %136 = arith.mulf %131, %135 : vector<24x24xf32>
    %137 = arith.truncf %136 : vector<24x24xf32> to vector<24x24xbf16>
    %cst_44 = arith.constant dense<0.000000e+00> : vector<24x32xf32>
    %138 = tpu.matmul %137, %122, %cst_44 {dimension_numbers = #tpu.dot_dimension_numbers<[1], [0], [0], [1], [0, 0, 1, 1], [], []>} : vector<24x24xbf16>, vector<24x32xbf16>, vector<24x32xf32> -> vector<24x32xf32>
    %139 = arith.truncf %138 : vector<24x32xf32> to vector<24x32xbf16>
    %c96 = arith.constant 96 : index
    %c0_45 = arith.constant 0 : index
    %140 = vector.load %arg6[%c96, %c0_45] : memref<128x128xbf16, #tpu.memory_space<vmem>>, vector<32x128xbf16>
    %cst_46 = arith.constant dense<0.000000e+00> : vector<24x128xf32>
    %141 = tpu.matmul %139, %140, %cst_46 {dimension_numbers = #tpu.dot_dimension_numbers<[1], [0], [0], [1], [0, 0, 1, 1], [], []>} : vector<24x32xbf16>, vector<32x128xbf16>, vector<24x128xf32> -> vector<24x128xf32>
    %142 = arith.addf %116, %141 : vector<24x128xf32>
    %143 = arith.addf %1, %142 : vector<24x128xf32>
    %c0_47 = arith.constant 0 : index
    %c0_48 = arith.constant 0 : index
    %144 = vector.load %arg7[%c0_47, %c0_48] : memref<1x128xf32, #tpu.memory_space<vmem>>, vector<1x128xf32>
    %145 = vector.broadcast %144 : vector<1x128xf32> to vector<24x128xf32>
    %146 = arith.addf %143, %145 : vector<24x128xf32>
    %c0_49 = arith.constant 0 : index
    %c0_50 = arith.constant 0 : index
    %147 = vector.load %arg8[%c0_49, %c0_50] : memref<1x128xf32, #tpu.memory_space<vmem>>, vector<1x128xf32>
    %c0_51 = arith.constant 0 : index
    %c0_52 = arith.constant 0 : index
    %148 = vector.load %arg9[%c0_51, %c0_52] : memref<1x128xf32, #tpu.memory_space<vmem>>, vector<1x128xf32>
    %cst_53 = arith.constant dense<0.000000e+00> : vector<24xf32>
    %149 = vector.multi_reduction <add>, %146, %cst_53 [1] : vector<24x128xf32> to vector<24xf32>
    %150 = vector.shape_cast %149 : vector<24xf32> to vector<24x1xf32>
    %cst_54 = arith.constant 1.280000e+02 : f32
    %151 = vector.broadcast %cst_54 : f32 to vector<24x1xf32>
    %152 = arith.divf %150, %151 : vector<24x1xf32>
    %153 = vector.broadcast %152 : vector<24x1xf32> to vector<24x128xf32>
    %154 = arith.subf %146, %153 : vector<24x128xf32>
    %155 = arith.mulf %154, %154 : vector<24x128xf32>
    %cst_55 = arith.constant dense<0.000000e+00> : vector<24xf32>
    %156 = vector.multi_reduction <add>, %155, %cst_55 [1] : vector<24x128xf32> to vector<24xf32>
    %157 = vector.shape_cast %156 : vector<24xf32> to vector<24x1xf32>
    %cst_56 = arith.constant 1.280000e+02 : f32
    %158 = vector.broadcast %cst_56 : f32 to vector<24x1xf32>
    %159 = arith.divf %157, %158 : vector<24x1xf32>
    %160 = vector.broadcast %152 : vector<24x1xf32> to vector<24x128xf32>
    %161 = arith.subf %146, %160 : vector<24x128xf32>
    %cst_57 = arith.constant 9.99999997E-7 : f32
    %162 = vector.broadcast %cst_57 : f32 to vector<24x1xf32>
    %163 = arith.addf %159, %162 : vector<24x1xf32>
    %164 = math.rsqrt %163 : vector<24x1xf32>
    %165 = vector.broadcast %164 : vector<24x1xf32> to vector<24x128xf32>
    %166 = arith.mulf %161, %165 : vector<24x128xf32>
    %167 = vector.broadcast %147 : vector<1x128xf32> to vector<24x128xf32>
    %168 = arith.mulf %166, %167 : vector<24x128xf32>
    %169 = vector.broadcast %148 : vector<1x128xf32> to vector<24x128xf32>
    %170 = arith.addf %168, %169 : vector<24x128xf32>
    %171 = arith.truncf %170 : vector<24x128xf32> to vector<24x128xbf16>
    %c0_58 = arith.constant 0 : index
    %c0_59 = arith.constant 0 : index
    %172 = vector.load %arg10[%c0_58, %c0_59] : memref<128x512xbf16, #tpu.memory_space<vmem>>, vector<128x512xbf16>
    %cst_60 = arith.constant dense<0.000000e+00> : vector<24x512xf32>
    %173 = tpu.matmul %171, %172, %cst_60 {dimension_numbers = #tpu.dot_dimension_numbers<[1], [0], [0], [1], [0, 0, 1, 1], [], []>} : vector<24x128xbf16>, vector<128x512xbf16>, vector<24x512xf32> -> vector<24x512xf32>
    %c0_61 = arith.constant 0 : index
    %c0_62 = arith.constant 0 : index
    %174 = vector.load %arg11[%c0_61, %c0_62] : memref<1x512xf32, #tpu.memory_space<vmem>>, vector<1x512xf32>
    %175 = vector.broadcast %174 : vector<1x512xf32> to vector<24x512xf32>
    %176 = arith.addf %173, %175 : vector<24x512xf32>
    %177 = arith.mulf %176, %176 : vector<24x512xf32>
    %178 = arith.mulf %176, %177 : vector<24x512xf32>
    %cst_63 = arith.constant 4.471500e-02 : f32
    %179 = vector.broadcast %cst_63 : f32 to vector<24x512xf32>
    %180 = arith.mulf %179, %178 : vector<24x512xf32>
    %181 = arith.addf %176, %180 : vector<24x512xf32>
    %cst_64 = arith.constant 0.797884583 : f32
    %182 = vector.broadcast %cst_64 : f32 to vector<24x512xf32>
    %183 = arith.mulf %182, %181 : vector<24x512xf32>
    %184 = math.tanh %183 : vector<24x512xf32>
    %cst_65 = arith.constant 1.000000e+00 : f32
    %185 = vector.broadcast %cst_65 : f32 to vector<24x512xf32>
    %186 = arith.addf %185, %184 : vector<24x512xf32>
    %cst_66 = arith.constant 5.000000e-01 : f32
    %187 = vector.broadcast %cst_66 : f32 to vector<24x512xf32>
    %188 = arith.mulf %187, %186 : vector<24x512xf32>
    %189 = arith.mulf %176, %188 : vector<24x512xf32>
    %190 = arith.truncf %189 : vector<24x512xf32> to vector<24x512xbf16>
    %c0_67 = arith.constant 0 : index
    %c0_68 = arith.constant 0 : index
    %191 = vector.load %arg12[%c0_67, %c0_68] : memref<512x128xbf16, #tpu.memory_space<vmem>>, vector<512x128xbf16>
    %cst_69 = arith.constant dense<0.000000e+00> : vector<24x128xf32>
    %192 = tpu.matmul %190, %191, %cst_69 {dimension_numbers = #tpu.dot_dimension_numbers<[1], [0], [0], [1], [0, 0, 1, 1], [], []>} : vector<24x512xbf16>, vector<512x128xbf16>, vector<24x128xf32> -> vector<24x128xf32>
    %c0_70 = arith.constant 0 : index
    %c0_71 = arith.constant 0 : index
    %193 = vector.load %arg13[%c0_70, %c0_71] : memref<1x128xf32, #tpu.memory_space<vmem>>, vector<1x128xf32>
    %194 = vector.broadcast %193 : vector<1x128xf32> to vector<24x128xf32>
    %195 = arith.addf %192, %194 : vector<24x128xf32>
    %196 = arith.addf %146, %195 : vector<24x128xf32>
    %c0_72 = arith.constant 0 : index
    %c0_73 = arith.constant 0 : index
    %c0_74 = arith.constant 0 : index
    %197 = vector.load %arg14[%c0_72, %c0_73, %c0_74] : memref<1x24x128xf32, #tpu.memory_space<vmem>>, vector<1x24x128xf32>
    %198 = vector.shape_cast %197 : vector<1x24x128xf32> to vector<24x128xf32>
    %199 = vector.shape_cast %196 : vector<24x128xf32> to vector<1x24x128xf32>
    tpu.vector_store %arg14[%c0_72, %c0_73, %c0_74], %199 {strides = array<i32>} : memref<1x24x128xf32, #tpu.memory_space<vmem>>, vector<1x24x128xf32>,
    return
  }
  func.func @transform_0(%arg0: i32) -> (i32, i32, i32) {
    %c0_i32 = arith.constant 0 : i32
    %c0_i32_0 = arith.constant 0 : i32
    %c0_i32_1 = arith.constant 0 : i32
    return %arg0, %c0_i32, %c0_i32_0 : i32, i32, i32
  }
  func.func @transform_1(%arg0: i32) -> (i32, i32) {
    %c0_i32 = arith.constant 0 : i32
    %c0_i32_0 = arith.constant 0 : i32
    %c0_i32_1 = arith.constant 0 : i32
    return %c0_i32, %c0_i32_0 : i32, i32
  }
  func.func @transform_2(%arg0: i32) -> (i32, i32) {
    %c0_i32 = arith.constant 0 : i32
    %c0_i32_0 = arith.constant 0 : i32
    %c0_i32_1 = arith.constant 0 : i32
    return %c0_i32, %c0_i32_0 : i32, i32
  }
  func.func @transform_3(%arg0: i32) -> (i32, i32) {
    %c0_i32 = arith.constant 0 : i32
    %c0_i32_0 = arith.constant 0 : i32
    %c0_i32_1 = arith.constant 0 : i32
    return %c0_i32, %c0_i32_0 : i32, i32
  }
  func.func @transform_4(%arg0: i32) -> (i32, i32) {
    %c0_i32 = arith.constant 0 : i32
    %c0_i32_0 = arith.constant 0 : i32
    %c0_i32_1 = arith.constant 0 : i32
    return %c0_i32, %c0_i32_0 : i32, i32
  }
  func.func @transform_5(%arg0: i32) -> (i32, i32) {
    %c0_i32 = arith.constant 0 : i32
    %c0_i32_0 = arith.constant 0 : i32
    %c0_i32_1 = arith.constant 0 : i32
    return %c0_i32, %c0_i32_0 : i32, i32
  }
  func.func @transform_6(%arg0: i32) -> (i32, i32) {
    %c0_i32 = arith.constant 0 : i32
    %c0_i32_0 = arith.constant 0 : i32
    %c0_i32_1 = arith.constant 0 : i32
    return %c0_i32, %c0_i32_0 : i32, i32
  }
  func.func @transform_7(%arg0: i32) -> (i32, i32) {
    %c0_i32 = arith.constant 0 : i32
    %c0_i32_0 = arith.constant 0 : i32
    %c0_i32_1 = arith.constant 0 : i32
    return %c0_i32, %c0_i32_0 : i32, i32
  }
  func.func @transform_8(%arg0: i32) -> (i32, i32) {
    %c0_i32 = arith.constant 0 : i32
    %c0_i32_0 = arith.constant 0 : i32
    %c0_i32_1 = arith.constant 0 : i32
    return %c0_i32, %c0_i32_0 : i32, i32
  }
  func.func @transform_9(%arg0: i32) -> (i32, i32) {
    %c0_i32 = arith.constant 0 : i32
    %c0_i32_0 = arith.constant 0 : i32
    %c0_i32_1 = arith.constant 0 : i32
    return %c0_i32, %c0_i32_0 : i32, i32
  }
  func.func @transform_10(%arg0: i32) -> (i32, i32) {
    %c0_i32 = arith.constant 0 : i32
    %c0_i32_0 = arith.constant 0 : i32
    %c0_i32_1 = arith.constant 0 : i32
    return %c0_i32, %c0_i32_0 : i32, i32
  }
  func.func @transform_11(%arg0: i32) -> (i32, i32) {
    %c0_i32 = arith.constant 0 : i32
    %c0_i32_0 = arith.constant 0 : i32
    %c0_i32_1 = arith.constant 0 : i32
    return %c0_i32, %c0_i32_0 : i32, i32
  }
  func.func @transform_12(%arg0: i32) -> (i32, i32) {
    %c0_i32 = arith.constant 0 : i32
    %c0_i32_0 = arith.constant 0 : i32
    %c0_i32_1 = arith.constant 0 : i32
    return %c0_i32, %c0_i32_0 : i32, i32
  }
  func.func @transform_13(%arg0: i32) -> (i32, i32, i32) {
    %c0_i32 = arith.constant 0 : i32
    %c0_i32_0 = arith.constant 0 : i32
    %c0_i32_1 = arith.constant 0 : i32
    return %arg0, %c0_i32, %c0_i32_0 : i32, i32, i32
  }
}

</mosaic_0001>

<bundles_post_ra>
// kernel: vision_encoder_forward.4
= control target key start
LH: loop header
LB: loop body
LE: loop exit
PB: predicated region body
PF: predicated region fallthrough
CT: control target
= control target key end

     0   :  { %vm60_vm0 = vcmask 523264   ;;  %s212_s1 = inlined_call_operand.vmem [shape: bf16[64,128], index: 1, kind: input, shape index: {}]   ;;  %s213_s0 = inlined_call_operand.vmem [shape: f32[32,64], index: 0, kind: input, shape index: {}]   ;;  %s214_s2 = inlined_call_operand.vmem [shape: f32[1,128], index: 2, kind: input, shape index: {}]   ;;  %s215_s3 = inlined_call_operand.vmem [shape: f32[32,128], index: 3, kind: output, shape index: {}]  }
   0x1   :  { %v149_v0 = vld [vmem:[%s212_s1] sm:$0xff]   ;;  %v150_v1 = vld [vmem:[%s212_s1 + $0x8] sm:$0xff]   ;;  %v151_v2 = vld [vmem:[%s212_s1 + $0x10] sm:$0xff]  }
   0x2   :  { %137 = vmatprep.subr.bf16.mxu0 %v149_v0  ;;  %v15_v3 = vld [vmem:[%s213_s0] sm:$0xff]  ;;  %v16_v4 = vld [vmem:[%s213_s0 + $0x8] sm:$0xff]  ;;  %v152_v6 = vld [vmem:[%s212_s1 + $0x18] sm:$0xff]  }
   0x3   :  { %138 = vmatpush3.bf16.msra.mxu0 %v149_v0  ;;  %v19_v5 = vpack.c.bf16 %v16_v4, %v15_v3  ;;  %v17_v7 = vld [vmem:[%s213_s0 + $0x10] sm:$0xff]  ;;  %v18_v8 = vld [vmem:[%s213_s0 + $0x18] sm:$0xff]  ;;  %v124_v10 = vld [vmem:[%s214_s2] ss:$0 sm:$0xff] }
   0x4   :  { %139 = vmatprep.subr.bf16.mxu0 %v150_v1  ;;  %v20_v9 = vpack.c.bf16 %v18_v8, %v17_v7 }
   0x5   :  { %145 = vmatprep.mubr.msk.bf16.mxu0 %vm60_vm0, %v19_v5 }
   0x7   :  { %140 = vmatpush3.bf16.msra.mxu0 %v150_v1 }
   0x8   :  { %141 = vmatprep.subr.bf16.mxu0 %v151_v2 }
   0xb   :  { %142 = vmatpush3.bf16.msra.mxu0 %v151_v2 }
   0xc   :  { %143 = vmatprep.subr.bf16.mxu0 %v152_v6 }
   0xf   :  { %144 = vmatpush3.bf16.msra.mxu0 %v152_v6 }
  0x12   :  { %146 = vmatmul.mubr.msk.bf16.vlgmr.msra.gmra.mrb[0].mxu0 %vm60_vm0, %v20_v9 }
  0xe5   :  { %v147_v11 = vpop.f32.mrb[0].mxu0 }
  0xe6   :  { %v110_v12 = vadd.f32 %v147_v11, %v124_v10  ;;  %v101_v13 = vpop.f32.mrb[1].mxu0 }
  0xe7   :  { %v102_v14 = vadd.f32 %v124_v10, %v101_v13  ;;  %v148_v15 = vpop.f32.mrb[2].mxu0 }
  0xe8   :  { %118 = vst [vmem:[%s215_s3 + $0x10] sm:$0xff] %v110_v12  ;;  %v113_v16 = vadd.f32 %v148_v15, %v124_v10  ;;  %v104_v17 = vpop.f32.mrb[3].mxu0 }
  0xe9   :  { %116 = vst [vmem:[%s215_s3] sm:$0xff] %v102_v14  ;;  %v105_v18 = vadd.f32 %v124_v10, %v104_v17 }
  0xea   :  { %119 = vst [vmem:[%s215_s3 + $0x18] sm:$0xff] %v113_v16 }
  0xeb   :  { %117 = vst [vmem:[%s215_s3 + $0x8] sm:$0xff] %v105_v18 }

// kernel: vision_encoder_forward.7
= control target key start
LH: loop header
LB: loop body
LE: loop exit
PB: predicated region body
PF: predicated region fallthrough
CT: control target
= control target key end

     0   :  { %s1480_s0 = inlined_call_operand.vmem [shape: f32[2,24,128], index: 0, kind: input, shape index: {}]   ;;  %s1481_s1 = inlined_call_operand.vmem [shape: f32[1,128], index: 1, kind: input, shape index: {}]   ;;  %s1482_s2 = inlined_call_operand.vmem [shape: f32[1,128], index: 2, kind: input, shape index: {}]   ;;  %s1483_s3 = inlined_call_operand.vmem [shape: bf16[128,128], index: 3, kind: input, shape index: {}]   ;;  %s1484_s4 = inlined_call_operand.vmem [shape: f32[1,128], index: 4, kind: input, shape index: {}]   ;;  %s1485_s5 = inlined_call_operand.vmem [shape: f32[1,128], index: 5, kind: input, shape index: {}]   ;;  %s1486_s6 = inlined_call_operand.vmem [shape: f32[1,128], index: 6, kind: input, shape index: {}]   ;;  %s1487_s7 = inlined_call_operand.vmem [shape: bf16[128,128], index: 7, kind: input, shape index: {}]   ;;  %s1488_s8 = inlined_call_operand.vmem [shape: f32[1,128], index: 8, kind: input, shape index: {}]   ;;  %s1489_s9 = inlined_call_operand.vmem [shape: f32[1,128], index: 9, kind: input, shape index: {}]   ;;  %s1490_s10 = inlined_call_operand.vmem [shape: f32[1,128], index: 10, kind: input, shape index: {}]   ;;  %s1491_s11 = inlined_call_operand.hbm [shape: f32[2,16,128], index: 11, kind: output, shape index: {0}]   ;;  %s1492_s12 = inlined_call_operand.hbm [shape: f32[2,1,128], index: 12, kind: output, shape index: {1}]  }
   0x1   :  { %1494 = sst [smem:[#allocation8_spill]] %s1480_s0 }
   0x2   :  { %1495 = sst [smem:[#allocation9_spill]] %s1481_s1 }
   0x3   :  { %1496 = sst [smem:[#allocation10_spill]] %s1482_s2 }
   0x4   :  { %1497 = sst [smem:[#allocation11_spill]] %s1483_s3 }
   0x5   :  { %18 = vsyncpa [#allocation3], 0 }
   0x6   :  { %20 = vsyncpa [#allocation3 + $0x1], 0 }
   0x7   :  { %21 = vsyncpa [#allocation5], 0 }
   0x8   :  { %23 = vsyncpa [#allocation5 + $0x1], 0  ;;  %s1232_s21 = smov 0   ;;  %s1234_s22 = smov 0  }
   0x9   :  { %s1236_s23 = smov 0   ;;  %s1238_s24 = smov 0  }
   0xa LB: > { %s1253_s25 = sadd.s32 4294967295, %s1159_s24   ;;  %s896_s26 = sadd.s32 4294967294, %s1159_s24   ;;  %s1159_s24 = sphi %s1238_s24, %s1508_s24   ;;  %s1155_s23 = sphi %s1236_s23, %s1507_s23   ;;  %s1151_s22 = sphi %s1234_s22, %s1506_s22   ;;  %s1147_s21 = sphi %s1232_s21, %s1505_s21  }
   0xb   : > { %s1257_s27 = sadd.s32 1, %s1159_s24   ;;  %s272_s28 = sadd.s32 1, %s1155_s23 }
   0xc   : > { %s269_s29 = ssub.s32 %s1159_s24, %s1257_s27  ;;  %p282_p0 = scmp.ne.s32.totalorder %s1155_s23, %s1151_s22 }
   0xd   : > { %p270_p1 = scmp.eq.s32.totalorder %s269_s29, 0  ;;  %p283_p2 = scmp.eq.s32.totalorder %s1253_s25, 1 }
   0xe   : > { %p288_p3 = scmp.ne.s32.totalorder %s1151_s22, %s1147_s21  ;;  %p289_p4 = scmp.eq.s32.totalorder %s896_s26, 1 }
   0xf   : > { %s1268_s30 = scalar_select %p270_p1, %s1155_s23, %s272_s28  }
  0x10   : > { %p1270_p5 = por %p283_p2, %p282_p0  ;;  %p1274_p6 = por %p289_p4, %p288_p3 }
  0x11   : > { %p899_p7 = scmp.ge.s32.totalorder %s1159_s24, 1  ;;  %p371_p8 = scmp.lt.s32.totalorder %s1159_s24, 3 }
  0x13   : > { %p372_p9 = pnand %p899_p7, %p371_p8 }
  0x14   : > { %p417_p10 = scmp.lt.s32.totalorder (!%p372_p9), %s1253_s25, 1  ;;  %s1500_s0 = sld [smem:[#allocation8_spill]] (!%p372_p9)  ;;  %v1037_v3 = vld [vmem:[%s1487_s7] sm:$0xff] (!%p372_p9)   ;;  %v1161_v4 = vmov (!%p372_p9), 0.0   ;;  %v1038_v5 = vld [vmem:[%s1487_s7 + $0x8] sm:$0xff] (!%p372_p9)   ;;  %v1039_v18 = vld [vmem:[%s1487_s7 + $0x10] sm:$0xff] (!%p372_p9)  }
  0x15   : > { %375 = sbr.rel (%p372_p9) target bundleno = 924 (0x39c), region = 64  ;;  %968 = vmatprep.subr.bf16.mxu1 (!%p372_p9), %v1161_v4  ;;  %948 = vmatprep.subr.bf16.mxu0 (!%p372_p9), %v1161_v4  ;;  %s1501_s3 = sld [smem:[#allocation11_spill]] (!%p372_p9)  ;;  %v1041_v20 = vld [vmem:[%s1487_s7 + $0x18] sm:$0xff] (!%p372_p9)   ;;  %v1043_v22 = vld [vmem:[%s1487_s7 + $0x20] sm:$0xff] (!%p372_p9)   ;;  %v1045_v24 = vld [vmem:[%s1487_s7 + $0x28] sm:$0xff] (!%p372_p9)   ;;  %vm1162_vm0 = vmmov (!%p372_p9), 0  }
  0x16   : > { %969 = vmatpush3.bf16.msra.mxu1 (!%p372_p9), %v1037_v3  ;;  %v1047_v26 = vld [vmem:[%s1487_s7 + $0x30] sm:$0xff] (!%p372_p9)   ;;  %v1049_v28 = vld [vmem:[%s1487_s7 + $0x38] sm:$0xff] (!%p372_p9)   ;;  %984 = vmatprep.mubr.msk.bf16.mxu1 (!%p372_p9), %vm1162_vm0, %v1161_v4  ;;  %s1502_s1 = sld [smem:[#allocation9_spill]] (!%p372_p9)  ;;  %s1503_s2 = sld [smem:[#allocation10_spill]] (!%p372_p9)  ;;  %vm505_vm1 = vsmask.f32 (!%p372_p9), 7424 }
  0x17   : > { %970 = vmatprep.subr.bf16.mxu1 (!%p372_p9), %v1161_v4  ;;  %964 = vmatprep.mubr.msk.bf16.mxu0 (!%p372_p9), %vm1162_vm0, %v1161_v4  ;;  %vm758_vm2 = vcmask (!%p372_p9), 1040384   ;;  %s929_s26 = sshll.u32 (!%p372_p9), %s1253_s25, 8 }
  0x1a   : > { %971 = vmatpush3.bf16.msra.mxu1 (!%p372_p9), %v1038_v5 }
  0x1b   : > { %972 = vmatprep.subr.bf16.mxu1 (!%p372_p9), %v1161_v4  ;;  %v1040_v19 = vld [vmem:[%s1501_s3] sm:$0xff] (!%p372_p9)   ;;  %v1042_v21 = vld [vmem:[%s1501_s3 + $0x8] sm:$0xff] (!%p372_p9)   ;;  %v1044_v23 = vld [vmem:[%s1501_s3 + $0x10] sm:$0xff] (!%p372_p9)  }
  0x1c   : > { %s418_s15 = scalar_select %p417_p10, %s1253_s25, 1  ;;  %949 = vmatpush3.bf16.msra.mxu0 %v1040_v19  ;;  %v1046_v25 = vld [vmem:[%s1501_s3 + $0x18] sm:$0xff]   ;;  %v1048_v27 = vld [vmem:[%s1501_s3 + $0x20] sm:$0xff]   ;;  %v1050_v29 = vld [vmem:[%s1501_s3 + $0x28] sm:$0xff]  }
  0x1d   : > { %950 = vmatprep.subr.bf16.mxu0 %v1161_v4  ;;  %v1051_v30 = vld [vmem:[%s1501_s3 + $0x30] sm:$0xff]   ;;  %v1052_v31 = vld [vmem:[%s1501_s3 + $0x38] sm:$0xff]   ;;  %v902_v42 = vld [vmem:[%s1502_s1] ss:$0 sm:$0xff] }
  0x1e   : > { %s988_s16 = smul.u32 24, %s418_s15  ;;  %973 = vmatpush3.bf16.msra.mxu1 %v1039_v18  ;;  %v903_v44 = vld [vmem:[%s1503_s2] ss:$0 sm:$0xff]  ;;  %s1381_s15 = sand.u32 1, %s1151_s22  }
  0x1f   : > { %974 = vmatprep.subr.bf16.mxu1 %v1161_v4  ;;  %s1493_s1 = scalar_lea.vmem [#allocation4], %s1381_s15  ;;  %s776_s3 = scalar_lea.sflag [#allocation3], %s1381_s15 }
  0x20   : > { %s421_s19 = scalar_lea.vmem %s1500_s0, %s988_s16  ;;  %951 = vmatpush3.bf16.msra.mxu0 %v1042_v21  ;;  %s900_s16 = sshll.u32 %s1381_s15, 4 }
  0x21   : > { %v423_v0 = vld [vmem:[%s421_s19] sm:$0xff]  ;;  %v425_v1 = vld [vmem:[%s421_s19 + $0x10] sm:$0xff]  ;;  %v424_v2 = vld [vmem:[%s421_s19 + $0x8] sm:$0xff]  ;;  %952 = vmatprep.subr.bf16.mxu0 %v1161_v4  ;;  %s410_s28 = scalar_lea.vmem [#allocation2], %s900_s16  ;;  %s1397_s19 = scalar_lea.hbm %s1491_s11, %s929_s26 }
  0x22   : > { %428 = vadd.xlane.f32.xlu0 %v423_v0  ;;  %432 = vadd.xlane.f32.xlu1 %v425_v1  ;;  %s793_s29 = sshll.u32 %s410_s28, 4  ;;  %s926_s0 = sshll.u32 %s1253_s25, 4  ;;  %s1399_s29 = int_to_ptr.vmem [resolvable:$true] %s793_s29 }
  0x23   : > { %975 = vmatpush3.bf16.msra.mxu1 %v1041_v20  ;;  %s809_s2 = sshll.u32 %s1493_s1, 4  ;;  %s1411_s18 = scalar_lea.hbm %s1492_s12, %s926_s0  ;;  %s1413_s2 = int_to_ptr.vmem [resolvable:$true] %s809_s2 }
  0x24   : > { %976 = vmatprep.subr.bf16.mxu1 %v1161_v4  ;;  %953 = vmatpush3.bf16.msra.mxu0 %v1044_v23  ;;  %s1065_s16 = scalar_lea.vmem %s1399_s29, 256  ;;  %s1163_s25 = smov [#allocation2]  }
  0x25   : > { %954 = vmatprep.subr.bf16.mxu0 %v1161_v4  ;;  %p1066_p11 = scmp.ne.s32.totalorder %s1399_s29, %s1065_s16  ;;  %s1069_s20 = sshll.u32 %s1163_s25, 4  ;;  %s1070_s20 = int_to_ptr.vmem [resolvable:$false] %s1069_s20 }
  0x26   : > { %430 = vadd.xlane.f32.xlu0 %v424_v2  ;;  %s1071_s1 = scalar_lea.vmem %s1070_s20, 512  ;;  %p1072_p0 = scmp.lt.s32.totalorder %s1399_s29, %s1070_s20 }
  0x27   : > { %977 = vmatpush3.bf16.msra.mxu1 %v1043_v22  ;;  %p1067_p12 = pnand %p1066_p11, %p1270_p5  ;;  %p1073_p1 = scmp.lt.s32.totalorder %s1071_s1, %s1065_s16 }
  0x28   : > { %978 = vmatprep.subr.bf16.mxu1 %v1161_v4  ;;  %955 = vmatpush3.bf16.msra.mxu0 %v1046_v25 }
  0x29   : > { %956 = vmatprep.subr.bf16.mxu0 %v1161_v4  ;;  %p1068_p13 = pneg %p1067_p12  ;;  %p1074_p2 = por %p1073_p1, %p1072_p0 }
  0x2b   : > { %979 = vmatpush3.bf16.msra.mxu1 %v1045_v24  ;;  %p1075_p3 = pnand %p1074_p2, %p1068_p13 }
  0x2c   : > { %980 = vmatprep.subr.bf16.mxu1 %v1161_v4  ;;  %957 = vmatpush3.bf16.msra.mxu0 %v1048_v27 }
  0x2d   : > { %958 = vmatprep.subr.bf16.mxu0 %v1161_v4 }
  0x2f   : > { %981 = vmatpush3.bf16.msra.mxu1 %v1047_v26 }
  0x30   : > { %982 = vmatprep.subr.bf16.mxu1 %v1161_v4  ;;  %959 = vmatpush3.bf16.msra.mxu0 %v1050_v29 }
  0x31   : > { %960 = vmatprep.subr.bf16.mxu0 %v1161_v4 }
  0x33   : > { %983 = vmatpush3.bf16.msra.mxu1 %v1049_v28 }
  0x34   : > { %961 = vmatpush3.bf16.msra.mxu0 %v1051_v30 }
  0x35   : > { %962 = vmatprep.subr.bf16.mxu0 %v1161_v4 }
  0x38   : > { %963 = vmatpush3.bf16.msra.mxu0 %v1052_v31 }
  0xaf   : > { %v429_v6 = vpop.xlane.xlu0 %428  ;;  %v433_v7 = vpop.xlane.xlu1 %432 }
  0xb0   : > { %v435_v8 = vmul.f32 0.0078125, %v429_v6  ;;  %v437_v9 = vmul.f32 0.0078125, %v433_v7 }
  0xb2   : > { %v1295_v10 = vsub.f32 %v423_v0, %v435_v8  ;;  %v1297_v11 = vsub.f32 %v425_v1, %v437_v9  ;;  %v667_v1 = vld [vmem:[%s1488_s8] sm:$0x1] }
  0xb3   : > { %v431_v12 = vpop.xlane.xlu0 %430  ;;  %v904_v8 = vld [vmem:[%s1484_s4] ss:$0 sm:$0xff] }
  0xb4   : > { %v436_v13 = vmul.f32 0.0078125, %v431_v12  ;;  %v441_v14 = vmul.f32 %v1295_v10, %v1295_v10  ;;  %v443_v16 = vmul.f32 %v1297_v11, %v1297_v11 }
  0xb6   : > { %v1301_v15 = vsub.f32 %v424_v2, %v436_v13  ;;  %444 = vadd.xlane.f32.xlu1 %v441_v14 }
  0xb8   : > { %v442_v17 = vmul.f32 %v1301_v15, %v1301_v15 }
  0xba   : > { %448 = vadd.xlane.f32.xlu1 %v443_v16  ;;  %446 = vadd.xlane.f32.xlu0 %v442_v17 }
 0x143   : > { %v445_v32 = vpop.xlane.xlu1 %444 }
 0x144   : > { %v450_v33 = vmul.f32 0.0078125, %v445_v32 }
 0x146   : > { %v453_v34 = vadd.f32 1e-06, %v450_v33 }
 0x147   : > { %v449_v35 = vpop.xlane.xlu1 %448  ;;  %v447_v36 = vpop.xlane.xlu0 %446 }
 0x148   : > { %1053 = vrsqrt.f32 %v453_v34  ;;  %v452_v37 = vmul.f32 0.0078125, %v449_v35  ;;  %v451_v38 = vmul.f32 0.0078125, %v447_v36 }
 0x14a   : > { %v455_v39 = vadd.f32 1e-06, %v452_v37  ;;  %v454_v40 = vadd.f32 1e-06, %v451_v38  ;;  %v913_v38 = vld [vmem:[%s1485_s5] ss:$0 sm:$0xff] }
 0x14c   : > { %1055 = vrsqrt.f32 %v455_v39 }
 0x14d   : > { %1057 = vrsqrt.f32 %v454_v40 }
 0x152   : > { %v1054_v41 = vpop.eup %1053 }
 0x153   : > { %v459_v43 = vmul.f32 %v1054_v41, %v1295_v10  ;;  %v914_v41 = vld [vmem:[%s1486_s6] ss:$0 sm:$0xff] }
 0x155   : > { %v468_v45 = vmul.f32 %v902_v42, %v459_v43 }
 0x156   : > { %v1056_v46 = vpop.eup %1055 }
 0x157   : > { %v1058_v47 = vpop.eup %1057  ;;  %v477_v48 = vadd.f32 %v903_v44, %v468_v45  ;;  %v461_v49 = vmul.f32 %v1056_v46, %v1297_v11  ;;  %v756_v45 = vld [vmem:[%s1489_s9] sm:$0x1] }
 0x158   : > { %v460_v50 = vmul.f32 %v1058_v47, %v1301_v15 }
 0x159   : > { %v650_v51 = vpack.c.bf16 %v477_v48, %v477_v48  ;;  %v470_v52 = vmul.f32 %v902_v42, %v461_v49  ;;  %v757_v49 = vld [vmem:[%s1490_s10] sm:$0x1] }
 0x15a   : > { %v469_v53 = vmul.f32 %v902_v42, %v460_v50 }
 0x15b   : > { %985 = vmatmul.mubr.bf16.vlgmr.msra.gmra.mrb[0].mxu1 %v650_v51  ;;  %v479_v54 = vadd.f32 %v903_v44, %v470_v52 }
 0x15c   : > { %v478_v55 = vadd.f32 %v903_v44, %v469_v53 }
 0x15d   : > { %v481_v56 = vpack.c.bf16 %v479_v54, %v479_v54 }
 0x15e   : > { %v480_v57 = vpack.c.bf16 %v478_v55, %v477_v48 }
 0x15f   : > { %v514_v59 = vshll.u32 %v481_v56, 16 }
 0x160   : > { %v509_v58 = vshll.u32 %v480_v57, 16  ;;  %v507_v60 = vshrl.u32 %v480_v57, 16 }
 0x161   : > { %v516_v63 = vrot.slane %v514_v59, 1 }
 0x162   : > { %v511_v61 = vrot.slane %v509_v58, 1 }
 0x164   : > { %v512_v62 = vor.u32 %v511_v61, %v507_v60 }
 0x166   : > { %v517_v0 = vsel %vm505_vm1, %v512_v62, %v516_v63 }
 0x167   : > { %965 = vmatmul.mubr.bf16.vlgmr.msra.gmra.mrb[0].mxu0 %v517_v0 }
 0x22e   : > { %v750_v2 = vpop.f32.mrb[0].mxu1 }
 0x22f   : > { %v751_v3 = vadd.f32 %v750_v2, %v667_v1  ;;  %v986_v4 = vpop.f32.mrb[1].mxu1 }
 0x230   : > { %v753_v5 = vpop.f32.mrb[2].mxu1 }
 0x231   : > { %v987_v6 = vpop.f32.mrb[3].mxu1  ;;  %v759_v7 = vsel %vm758_vm2, %v751_v3, 0.0 }
 0x232   : > { %760 = vadd.xlane.f32.xlu0 %v759_v7 }
 0x23a   : > { %v601_v9 = vpop.f32.mrb[0].mxu0 }
 0x23b   : > { %v602_v10 = vadd.f32 %v904_v8, %v601_v9  ;;  %v966_v11 = vpop.f32.mrb[1].mxu0 }
 0x23c   : > { %v604_v12 = vpop.f32.mrb[2].mxu0 }
 0x23d   : > { %v605_v13 = vadd.f32 %v904_v8, %v604_v12  ;;  %610 = vadd.xlane.f32.xlu1 %v602_v10  ;;  %v967_v14 = vpop.f32.mrb[3].mxu0 }
 0x23f   : > { %612 = vadd.xlane.f32.xlu0 %v605_v13 }
 0x2bf   : > { %v761_v15 = vpop.xlane.xlu0 %760 }
 0x2c0   : > { %v762_v16 = vmul.f32 0.0078125, %v761_v15 }
 0x2c2   : > { %v763_v19 = vsub.f32 %v751_v3, %v762_v16 }
 0x2c4   : > { %v764_v25 = vmul.f32 %v763_v19, %v763_v19 }
 0x2c6   : > { %v765_v27 = vsel %vm758_vm2, %v764_v25, 0.0 }
 0x2ca   : > { %v611_v17 = vpop.xlane.xlu1 %610 }
 0x2cb   : > { %v614_v18 = vmul.f32 0.0078125, %v611_v17 }
 0x2cc   : > { %v613_v20 = vpop.xlane.xlu0 %612 }
 0x2cd   : > { %v616_v21 = vsub.f32 %v602_v10, %v614_v18  ;;  %v615_v22 = vmul.f32 0.0078125, %v613_v20 }
 0x2cf   : > { %v617_v23 = vsub.f32 %v605_v13, %v615_v22  ;;  %v618_v24 = vmul.f32 %v616_v21, %v616_v21 }
 0x2d1   : > { %620 = vadd.xlane.f32.xlu1 %v618_v24  ;;  %v619_v26 = vmul.f32 %v617_v23, %v617_v23 }
 0x2d3   : > { %622 = vadd.xlane.f32.xlu0 %v619_v26 }
 0x2d5   : > { %766 = vadd.xlane.f32.xlu1 %v765_v27 }
 0x35e   : > { %v621_v28 = vpop.xlane.xlu1 %620 }
 0x35f   : > { %v624_v29 = vmul.f32 0.0078125, %v621_v28 }
 0x360   : > { %v623_v30 = vpop.xlane.xlu0 %622 }
 0x361   : > { %v626_v31 = vadd.f32 1e-05, %v624_v29  ;;  %v625_v32 = vmul.f32 0.0078125, %v623_v30 }
 0x362   : > { %v767_v33 = vpop.xlane.xlu1 %766 }
 0x363   : > { %1059 = vrsqrt.f32 %v626_v31  ;;  %v627_v34 = vadd.f32 1e-05, %v625_v32  ;;  %v768_v35 = vmul.f32 0.0078125, %v767_v33 }
 0x365   : > { %1061 = vrsqrt.f32 %v627_v34  ;;  %v769_v36 = vadd.f32 1e-05, %v768_v35 }
 0x367   : > { %1063 = vrsqrt.f32 %v769_v36 }
 0x36d   : > { %v1060_v37 = vpop.eup %1059 }
 0x36e   : > { %v630_v39 = vmul.f32 %v1060_v37, %v616_v21 }
 0x36f   : > { %v1062_v40 = vpop.eup %1061 }
 0x370   : > { %v638_v42 = vmul.f32 %v913_v38, %v630_v39  ;;  %v631_v43 = vmul.f32 %v1062_v40, %v617_v23 }
 0x371   : > { %v1064_v44 = vpop.eup %1063 }
 0x372   : > { %v639_v46 = vmul.f32 %v913_v38, %v631_v43  ;;  %v646_v47 = vadd.f32 %v914_v41, %v638_v42  ;;  %v771_v48 = vmul.f32 %v1064_v44, %v763_v19 }
 0x374   : > { %v647_v50 = vadd.f32 %v914_v41, %v639_v46  ;;  %648 = vst [vmem:[%s410_s28] sm:$0xff] %v646_v47  ;;  %v772_v51 = vmul.f32 %v771_v48, %v756_v45 }
 0x376   : > { %649 = vst [vmem:[%s410_s28 + $0x8] sm:$0xff] %v647_v50  ;;  %v773_v52 = vadd.f32 %v772_v51, %v757_v49 }
 0x377   : > { %1078 = shalt.err (!%p1075_p3)
}
 0x378   : > { %s1079_s28 = scalar_lea.hbm %s1397_s19, 256  ;;  %s1083_s17 = scalar_lea.hbm %s1491_s11, 512 }
 0x379   : > { %p1080_p4 = scmp.ne.s32.totalorder %s1397_s19, %s1079_s28  ;;  %p1084_p9 = scmp.lt.u32.totalorder %s1397_s19, %s1491_s11 }
 0x37a   : > { %p1085_p10 = scmp.lt.u32.totalorder %s1083_s17, %s1079_s28  ;;  %p1087_p12 = scmp.lt.u32.totalorder %s1079_s28, %s1397_s19 }
 0x37b   : > { %p1081_p7 = pnand %p1080_p4, %p1270_p5 }
 0x37c   : > { %p1086_p11 = por %p1085_p10, %p1084_p9 }
 0x37d   : > { %p1082_p8 = pneg %p1081_p7 }
 0x37e   : > { %p1088_p13 = por %p1087_p12, %p1086_p11 }
 0x380   : > { %p1089_p0 = pnand %p1088_p13, %p1082_p8 }
 0x382   : > { %1092 = shalt.err (!%p1089_p0)
}
 0x383   : > { %s1164_s1 = smov 128   ;;  %s1165_s16 = smov 8  }
 0x384   : > { %989 = dma.vmem_to_hbm [thread:$0]  (%p1270_p5), %s1399_s29, 256, %s1397_s19, %s776_s3, %s1164_s1, %s1164_s1, %s1165_s16  }
 0x385   : > { %s1504_s0 = scalar_lea.vmem [#allocation4], %s1381_s15  ;;  %s781_s28 = scalar_lea.sflag [#allocation5], %s1381_s15 }
 0x386   : > { %774 = vst [vmem:[%s1504_s0] sm:$0x1] %v773_v52  ;;  %s1093_s26 = scalar_lea.vmem %s1413_s2, 16  ;;  %s1166_s17 = smov [#allocation4]  }
 0x387   : > { %p1094_p1 = scmp.ne.s32.totalorder %s1413_s2, %s1093_s26  ;;  %s1097_s25 = sshll.u32 %s1166_s17, 4  ;;  %s1098_s25 = int_to_ptr.vmem [resolvable:$false] %s1097_s25 }
 0x388   : > { %s1099_s20 = scalar_lea.vmem %s1098_s25, 32  ;;  %p1100_p4 = scmp.lt.s32.totalorder %s1413_s2, %s1098_s25 }
 0x389   : > { %p1095_p2 = pnand %p1094_p1, %p1270_p5  ;;  %p1101_p7 = scmp.lt.s32.totalorder %s1099_s20, %s1093_s26 }
 0x38b   : > { %p1096_p3 = pneg %p1095_p2  ;;  %p1102_p8 = por %p1101_p7, %p1100_p4 }
 0x38d   : > { %p1103_p9 = pnand %p1102_p8, %p1096_p3 }
 0x38f   : > { %1106 = shalt.err (!%p1103_p9)
}
 0x390   : > { %s1107_s3 = scalar_lea.hbm %s1411_s18, 16  ;;  %s1111_s19 = scalar_lea.hbm %s1492_s12, 32 }
 0x391   : > { %p1108_p10 = scmp.ne.s32.totalorder %s1411_s18, %s1107_s3  ;;  %p1112_p13 = scmp.lt.u32.totalorder %s1411_s18, %s1492_s12 }
 0x392   : > { %p1113_p0 = scmp.lt.u32.totalorder %s1111_s19, %s1107_s3  ;;  %p1115_p2 = scmp.lt.u32.totalorder %s1107_s3, %s1411_s18 }
 0x393   : > { %p1109_p11 = pnand %p1108_p10, %p1270_p5 }
 0x394   : > { %p1114_p1 = por %p1113_p0, %p1112_p13 }
 0x395   : > { %p1110_p12 = pneg %p1109_p11 }
 0x396   : > { %p1116_p3 = por %p1115_p2, %p1114_p1 }
 0x398   : > { %p1117_p4 = pnand %p1116_p3, %p1110_p12 }
 0x39a   : > { %1120 = shalt.err (!%p1117_p4)
}
 0x39b   : > { %990 = dma.vmem_to_hbm [thread:$0]  (%p1270_p5), %s1413_s2, 16, %s1411_s18, %s781_s28  }
 0x39c PF: > { %p1000_p7 = scmp.ge.s32.totalorder %s1159_s24, 2  ;;  %s821_s0 = sand.u32 1, %s1147_s21  }
 0x39d   : > { %s822_s26 = scalar_lea.sflag [#allocation3], %s821_s0 }
 0x39e   : > { %p994_p8 = pnand %p1000_p7, %p1274_p6 }
 0x3a0   : > { %1138 = dma.done.wait (!%p994_p8), %s822_s26, 256  }
 0x3a1   : > { %1140 = vsyncadd (!%p994_p8), %s822_s26, 4294967040  ;;  %s831_s17 = scalar_lea.sflag [#allocation5], %s821_s0 }
 0x3a2   : > { %1142 = dma.done.wait (!%p994_p8), %s831_s17, 16  }
 0x3a3   : > { %1144 = vsyncadd (!%p994_p8), %s831_s17, 4294967280  ;;  %p26_p5 = scmp.ge.s32.totalorder %s1257_s27, 4   ;;  %s1505_s21 = smov %s1151_s22 }
 0x3a4   : > { %s1506_s22 = smov %s1155_s23  ;;  %s1507_s23 = smov %s1268_s30 }
 0x3a5   : > { %s1508_s24 = smov %s1257_s27  ;;  %28 = sbr.rel (!%p26_p5) target bundleno = 10 (0xa), region = 116 }
 0x3ac   :  { %835 = vsyncpa [#allocation3], 1 }
 0x3ad   :  { %837 = vsyncpa [#allocation3 + $0x1], 1 }
 0x3ae   :  { %838 = vsyncpa [#allocation5], 1 }
 0x3af   :  { %840 = vsyncpa [#allocation5 + $0x1], 1 }

// kernel: vision_encoder_forward.5
= control target key start
LH: loop header
LB: loop body
LE: loop exit
PB: predicated region body
PF: predicated region fallthrough
CT: control target
= control target key end

     0   :  { %s3362_s25 = smov 0   ;;  %s4041_s0 = inlined_call_operand.vmem [shape: f32[2,24,128], index: 0, kind: input, shape index: {}]   ;;  %s4042_s1 = inlined_call_operand.vmem [shape: f32[1,128], index: 1, kind: input, shape index: {}]   ;;  %s4043_s2 = inlined_call_operand.vmem [shape: f32[1,128], index: 2, kind: input, shape index: {}]   ;;  %s4044_s3 = inlined_call_operand.vmem [shape: bf16[128,384], index: 3, kind: input, shape index: {}]   ;;  %s4045_s4 = inlined_call_operand.vmem [shape: f32[1,384], index: 4, kind: input, shape index: {}]   ;;  %s4046_s5 = inlined_call_operand.vmem [shape: bf16[128,128], index: 5, kind: input, shape index: {}]   ;;  %s4047_s6 = inlined_call_operand.vmem [shape: f32[1,128], index: 6, kind: input, shape index: {}]   ;;  %s4048_s7 = inlined_call_operand.vmem [shape: f32[1,128], index: 7, kind: input, shape index: {}]   ;;  %s4049_s8 = inlined_call_operand.vmem [shape: f32[1,128], index: 8, kind: input, shape index: {}]   ;;  %s4050_s9 = inlined_call_operand.vmem [shape: bf16[128,512], index: 9, kind: input, shape index: {}]   ;;  %s4051_s10 = inlined_call_operand.vmem [shape: f32[1,512], index: 10, kind: input, shape index: {}]   ;;  %s4052_s11 = inlined_call_operand.vmem [shape: bf16[512,128], index: 11, kind: input, shape index: {}]   ;;  %s4053_s12 = inlined_call_operand.vmem [shape: f32[1,128], index: 12, kind: input, shape index: {}]   ;;  %s4054_s13 = inlined_call_operand.vmem [shape: f32[2,24,128], index: 13, kind: output, shape index: {}]  }
   0x1 LB: > { %s2681_s26 = sadd.s32 4294967295, %s3285_s25   ;;  %p2685_p0 = scmp.ge.s32.totalorder %s3285_s25, 1  ;;  %s3285_s25 = sphi %s3362_s25, %s23_s25  }
   0x2   : > { %p387_p1 = scmp.lt.s32.totalorder %s3285_s25, 3 }
   0x4   : > { %p388_p2 = pnand %p2685_p0, %p387_p1 }
   0x5   : > { %p431_p3 = scmp.lt.s32.totalorder (!%p388_p2), %s2681_s26, 1  ;;  %v3072_v3 = vld [vmem:[%s4044_s3 + $0x4] ss:$12 sps:$4 sm:$0xff] (!%p388_p2)   ;;  %v3074_v4 = vld [vmem:[%s4044_s3] ss:$12 sps:$4 sm:$0xff] (!%p388_p2)   ;;  %v3287_v35 = vmov (!%p388_p2), 0  }
   0x6   : > { %391 = sbr.rel (%p388_p2) target bundleno = 3892 (0xf34), region = 72  ;;  %v3075_v5 = vld [vmem:[%s4044_s3 + $0x8] ss:$12 sps:$4 sm:$0xff] (!%p388_p2)   ;;  %678 = vmatprep.subr.bf16.mxu0 (!%p388_p2), %v3072_v3  ;;  %v3078_v19 = vld [vmem:[%s4044_s3 + $0x18] ss:$12 sps:$4 sm:$0xff] (!%p388_p2)   ;;  %710 = vmatprep.mubr.bf16.mxu0 (!%p388_p2), %v3287_v35  ;;  %vm787_vm0 = vcmask (!%p388_p2), 261120  }
   0x7   : > { %v3076_v6 = vld [vmem:[%s4044_s3 + $0x1c] ss:$12 sps:$4 sm:$0xff] (!%p388_p2)   ;;  %2930 = vmatprep.subr.bf16.mxu1 (!%p388_p2), %v3075_v5  ;;  %679 = vmatpush1.bf16.msra.mxu0 (!%p388_p2), %v3074_v4  ;;  %v3079_v20 = vld [vmem:[%s4044_s3 + $0x20] ss:$12 sps:$4 sm:$0xff] (!%p388_p2)   ;;  %v3083_v23 = vld [vmem:[%s4044_s3 + $0x38] ss:$12 sps:$4 sm:$0xff] (!%p388_p2)  }
   0x8   : > { %2931 = vmatpush3.bf16.msra.mxu1 (!%p388_p2), %v3075_v5  ;;  %680 = vmatprep.subr.bf16.mxu0 (!%p388_p2), %v3076_v6  ;;  %v3080_v21 = vld [vmem:[%s4044_s3 + $0x34] ss:$12 sps:$4 sm:$0xff] (!%p388_p2)   ;;  %v3082_v22 = vld [vmem:[%s4044_s3 + $0x30] ss:$12 sps:$4 sm:$0xff] (!%p388_p2)   ;;  %v3084_v24 = vld [vmem:[%s4044_s3 + $0x4c] ss:$12 sps:$4 sm:$0xff] (!%p388_p2)  }
   0x9   : > { %2932 = vmatprep.subr.bf16.mxu1 (!%p388_p2), %v3079_v20  ;;  %v3086_v25 = vld [vmem:[%s4044_s3 + $0x48] ss:$12 sps:$4 sm:$0xff] (!%p388_p2)   ;;  %v3087_v26 = vld [vmem:[%s4044_s3 + $0x50] ss:$12 sps:$4 sm:$0xff] (!%p388_p2)   ;;  %v3090_v28 = vld [vmem:[%s4044_s3 + $0x60] ss:$12 sps:$4 sm:$0xff] (!%p388_p2)  }
   0xa   : > { %v3088_v27 = vld [vmem:[%s4044_s3 + $0x64] ss:$12 sps:$4 sm:$0xff] (!%p388_p2)   ;;  %v3091_v29 = vld [vmem:[%s4044_s3 + $0x68] ss:$12 sps:$4 sm:$0xff] (!%p388_p2)   ;;  %v3095_v31 = vld [vmem:[%s4044_s3 + $0x80] ss:$12 sps:$4 sm:$0xff] (!%p388_p2)  }
   0xb   : > { %681 = vmatpush1.bf16.msra.mxu0 (!%p388_p2), %v3078_v19  ;;  %v3092_v30 = vld [vmem:[%s4044_s3 + $0x7c] ss:$12 sps:$4 sm:$0xff] (!%p388_p2)   ;;  %v3094_v32 = vld [vmem:[%s4044_s3 + $0x78] ss:$12 sps:$4 sm:$0xff] (!%p388_p2)   ;;  %v3096_v33 = vld [vmem:[%s4044_s3 + $0x94] ss:$12 sps:$4 sm:$0xff] (!%p388_p2)  }
   0xc   : > { %2933 = vmatpush3.bf16.msra.mxu1 (!%p388_p2), %v3079_v20  ;;  %682 = vmatprep.subr.bf16.mxu0 (!%p388_p2), %v3080_v21  ;;  %v3099_v34 = vld [vmem:[%s4044_s3 + $0x98] ss:$12 sps:$4 sm:$0xff] (!%p388_p2)   ;;  %v3098_v36 = vld [vmem:[%s4044_s3 + $0x90] ss:$12 sps:$4 sm:$0xff] (!%p388_p2)   ;;  %v3102_v39 = vld [vmem:[%s4044_s3 + $0xa8] ss:$12 sps:$4 sm:$0xff] (!%p388_p2)  }
   0xd   : > { %s4056_s26 = smov (!%p431_p3, %s2681_s26), 1  ;;  %2934 = vmatprep.subr.bf16.mxu1 %v3083_v23  ;;  %v3100_v37 = vld [vmem:[%s4044_s3 + $0xac] ss:$12 sps:$4 sm:$0xff]   ;;  %v3103_v38 = vld [vmem:[%s4044_s3 + $0xb0] ss:$12 sps:$4 sm:$0xff]   ;;  %vm896_vm1 = vcmask 1043456  }
   0xe   : > { %s3058_s27 = smul.u32 24, %s4056_s26  ;;  %v2688_v51 = vld [vmem:[%s4042_s1] ss:$0 sm:$0xff]  ;;  %vm854_vm3 = vcmask 195584   ;;  %s3289_s16 = smov 96  }
   0xf   : > { %683 = vmatpush1.bf16.msra.mxu0 %v3082_v22  ;;  %v2689_v57 = vld [vmem:[%s4043_s2] ss:$0 sm:$0xff]  ;;  %s3290_s21 = smov 64   ;;  %s3291_s22 = smov 32  }
  0x10   : > { %s3378_s30 = scalar_lea.vmem %s4041_s0, %s3058_s27  ;;  %2935 = vmatpush3.bf16.msra.mxu1 %v3083_v23  ;;  %684 = vmatprep.subr.bf16.mxu0 %v3084_v24  ;;  %v533_v4 = vld [vmem:[%s4045_s4] sm:$0x7] }
  0x11   : > { %v442_v0 = vld [vmem:[%s3378_s30] sm:$0xff]  ;;  %v444_v1 = vld [vmem:[%s3378_s30 + $0x10] sm:$0xff]  ;;  %v443_v2 = vld [vmem:[%s3378_s30 + $0x8] sm:$0xff]  ;;  %2936 = vmatprep.subr.bf16.mxu1 %v3087_v26 }
  0x12   : > { %447 = vadd.xlane.f32.xlu0 %v442_v0  ;;  %451 = vadd.xlane.f32.xlu1 %v444_v1 }
  0x13   : > { %685 = vmatpush1.bf16.msra.mxu0 %v3086_v25 }
  0x14   : > { %2937 = vmatpush3.bf16.msra.mxu1 %v3087_v26  ;;  %686 = vmatprep.subr.bf16.mxu0 %v3088_v27 }
  0x15   : > { %2938 = vmatprep.subr.bf16.mxu1 %v3091_v29 }
  0x16   : > { %449 = vadd.xlane.f32.xlu0 %v443_v2 }
  0x17   : > { %687 = vmatpush1.bf16.msra.mxu0 %v3090_v28 }
  0x18   : > { %2939 = vmatpush3.bf16.msra.mxu1 %v3091_v29  ;;  %688 = vmatprep.subr.bf16.mxu0 %v3092_v30 }
  0x19   : > { %2940 = vmatprep.subr.bf16.mxu1 %v3095_v31 }
  0x1b   : > { %689 = vmatpush1.bf16.msra.mxu0 %v3094_v32 }
  0x1c   : > { %2941 = vmatpush3.bf16.msra.mxu1 %v3095_v31  ;;  %690 = vmatprep.subr.bf16.mxu0 %v3096_v33 }
  0x1d   : > { %2942 = vmatprep.subr.bf16.mxu1 %v3099_v34 }
  0x1f   : > { %691 = vmatpush1.bf16.msra.mxu0 %v3098_v36 }
  0x20   : > { %2943 = vmatpush3.bf16.msra.mxu1 %v3099_v34  ;;  %692 = vmatprep.subr.bf16.mxu0 %v3100_v37 }
  0x21   : > { %2944 = vmatprep.subr.bf16.mxu1 %v3103_v38 }
  0x23   : > { %693 = vmatpush1.bf16.msra.mxu0 %v3102_v39 }
  0x24   : > { %2945 = vmatpush3.bf16.msra.mxu1 %v3103_v38 }
  0x9f   : > { %v448_v7 = vpop.xlane.xlu0 %447  ;;  %v452_v8 = vpop.xlane.xlu1 %451 }
  0xa0   : > { %v454_v9 = vmul.f32 0.0078125, %v448_v7  ;;  %v456_v10 = vmul.f32 0.0078125, %v452_v8 }
  0xa2   : > { %v3395_v11 = vsub.f32 %v442_v0, %v454_v9  ;;  %v3397_v12 = vsub.f32 %v444_v1, %v456_v10  ;;  %v535_v1 = vlaneseq }
  0xa3   : > { %v450_v13 = vpop.xlane.xlu0 %449 }
  0xa4   : > { %v455_v14 = vmul.f32 0.0078125, %v450_v13  ;;  %v460_v15 = vmul.f32 %v3395_v11, %v3395_v11  ;;  %v462_v17 = vmul.f32 %v3397_v12, %v3397_v12 }
  0xa6   : > { %v3401_v16 = vsub.f32 %v443_v2, %v455_v14  ;;  %463 = vadd.xlane.f32.xlu1 %v460_v15  ;;  %v3478_v2 = vshrl.u32 %v535_v1, 7 }
  0xa8   : > { %v461_v18 = vmul.f32 %v3401_v16, %v3401_v16  ;;  %v537_v3 = vsub.s32 0, %v3478_v2  ;;  %v541_v5 = vsub.s32 1, %v3478_v2  ;;  %v545_v6 = vsub.s32 2, %v3478_v2 }
  0xaa   : > { %467 = vadd.xlane.f32.xlu1 %v462_v17  ;;  %465 = vadd.xlane.f32.xlu0 %v461_v18  ;;  %v538_v7 = vrot.slane %v533_v4, %v537_v3  ;;  %v542_v9 = vrot.slane %v533_v4, %v541_v5 }
 0x133   : > { %v464_v40 = vpop.xlane.xlu1 %463 }
 0x134   : > { %v469_v41 = vmul.f32 0.0078125, %v464_v40 }
 0x136   : > { %v472_v42 = vadd.f32 1e-06, %v469_v41  ;;  %v778_v41 = vand.u32 127, %v535_v1 }
 0x137   : > { %v468_v43 = vpop.xlane.xlu1 %467  ;;  %v466_v44 = vpop.xlane.xlu0 %465 }
 0x138   : > { %3192 = vrsqrt.f32 %v472_v42  ;;  %v471_v45 = vmul.f32 0.0078125, %v468_v43  ;;  %v470_v46 = vmul.f32 0.0078125, %v466_v44  ;;  %vm779_vm2 = vcmp.lt.s32.totalorder %v778_v41, 17 }
 0x139   : > { %v3288_v43 = vmov -1e+30  }
 0x13a   : > { %v474_v47 = vadd.f32 1e-06, %v471_v45  ;;  %v473_v48 = vadd.f32 1e-06, %v470_v46  ;;  %v3522_v44 = vsel %vm779_vm2, 0.0, %v3288_v43 }
 0x13c   : > { %3194 = vrsqrt.f32 %v474_v47 }
 0x13d   : > { %3196 = vrsqrt.f32 %v473_v48 }
 0x142   : > { %v3193_v49 = vpop.eup %3192 }
 0x143   : > { %v478_v50 = vmul.f32 %v3193_v49, %v3395_v11  ;;  %v546_v11 = vrot.slane %v533_v4, %v545_v6 }
 0x145   : > { %v487_v56 = vmul.f32 %v2688_v51, %v478_v50 }
 0x146   : > { %v3195_v52 = vpop.eup %3194 }
 0x147   : > { %v3197_v53 = vpop.eup %3196  ;;  %v480_v54 = vmul.f32 %v3195_v52, %v3397_v12  ;;  %v496_v61 = vadd.f32 %v2689_v57, %v487_v56 }
 0x148   : > { %v479_v55 = vmul.f32 %v3197_v53, %v3401_v16 }
 0x149   : > { %v489_v58 = vmul.f32 %v2688_v51, %v480_v54 }
 0x14a   : > { %v488_v59 = vmul.f32 %v2688_v51, %v479_v55 }
 0x14b   : > { %v498_v60 = vadd.f32 %v2689_v57, %v489_v58 }
 0x14c   : > { %v497_v62 = vadd.f32 %v2689_v57, %v488_v59 }
 0x14d   : > { %v500_v63 = vpack.c.bf16 %v498_v60, %v498_v60 }
 0x14e   : > { %v499_v0 = vpack.c.bf16 %v497_v62, %v496_v61 }
 0x150   : > { %711 = vmatmul.mubr.bf16.vlgmr.msra.gmra.mrb[0].mxu0 %v499_v0  ;;  %2946 = vmatprep.mubr.bf16.mxu1 %v499_v0 }
 0x151   : > { %2947 = vmatmul.mubr.bf16.vlgmr.msra.gmra.mrb[0].mxu1 %v500_v63  ;;  %720 = vmatprep.mubr.bf16.mxu0 %v3287_v35 }
 0x158   : > { %721 = vmatmul.mubr.bf16.gmra.mrb[4].mxu0 %v500_v63 }
 0x223   : > { %v712_v8 = vpop.f32.mrb[0].mxu0 }
 0x224   : > { %v714_v10 = vpop.f32.mrb[1].mxu0  ;;  %v2948_v12 = vpop.f32.mrb[0].mxu1  ;;  %v713_v15 = vadd.f32 %v712_v8, %v538_v7 }
 0x225   : > { %v716_v13 = vpop.f32.mrb[2].mxu0  ;;  %v763_v14 = vpop.f32.mrb[1].mxu1  ;;  %v715_v19 = vadd.f32 %v714_v10, %v542_v9  ;;  %v772_v22 = vadd.f32 %v2948_v12, %v546_v11 }
 0x226   : > { %v717_v16 = vadd.f32 %v716_v13, %v538_v7  ;;  %v718_v17 = vpop.f32.mrb[3].mxu0  ;;  %v2949_v18 = vpop.f32.mrb[2].mxu1  ;;  %v764_v24 = vadd.f32 %v763_v14, %v546_v11 }
 0x227   : > { %v719_v20 = vadd.f32 %v718_v17, %v542_v9  ;;  %v766_v21 = vpop.f32.mrb[3].mxu1  ;;  %v3504_v30 = vpack.c.bf16 %v772_v22, %v772_v22 }
 0x228   : > { %v3492_v23 = vpack.c.bf16 %v717_v16, %v713_v15  ;;  %v767_v25 = vadd.f32 %v766_v21, %v546_v11 }
 0x229   : > { %v3494_v26 = vpack.c.bf16 %v719_v20, %v715_v19  ;;  %v898_v37 = vsel %vm896_vm1, %v3504_v30, 0 }
 0x22a   : > { %v3496_v27 = vpack.c.bf16 %v767_v25, %v764_v24  ;;  %2954 = vmatprep.mubr.msk.bf16.mxu0 %vm787_vm0, %v3492_v23 }
 0x22b   : > { %v722_v28 = vpop.f32.mrb[4].mxu0  ;;  %3046 = vmatprep.subr.msk.bf16.mxu0 %vm787_vm0, %v3494_v26  ;;  %v795_v29 = vsel %vm787_vm0, %v3494_v26, 0 }
 0x22c   : > { %v724_v31 = vpop.f32.mrb[5].mxu0  ;;  %2951 = vmatpush3.bf16.xpose.msra.mxu0 %v795_v29  ;;  %2958 = vmatprep.subr.bf16.mxu1 %v3496_v27  ;;  %v723_v39 = vadd.f32 %v722_v28, %v538_v7 }
 0x22d   : > { %v725_v32 = vadd.f32 %v724_v31, %v542_v9  ;;  %v726_v33 = vpop.f32.mrb[6].mxu0  ;;  %2959 = vmatpush3.bf16.msra.mxu1 %v3496_v27  ;;  %v3104_v31 = vld [vmem:[%s4046_s5] sm:$0xff]  }
 0x22e   : > { %v727_v34 = vpop.f32.mrb[7].mxu0  ;;  %3048 = vmatprep.subr.msk.bf16.mxu1 %vm896_vm1, %v3504_v30  ;;  %v3518_v40 = vpack.c.bf16 %v723_v39, %v723_v39 }
 0x22f   : > { %v3510_v36 = vpack.c.bf16 %v725_v32, %v725_v32  ;;  %v3105_v34 = vld [vmem:[%s4046_s5 + $0x8] sm:$0xff]  }
 0x231   : > { %3047 = vmatprep.subr.msk.bf16.mxu0 %vm787_vm0, %v3510_v36  ;;  %2961 = vmatpush3.bf16.msra.mxu1 %v898_v37  ;;  %v798_v38 = vsel %vm787_vm0, %v3510_v36, 0 }
 0x234   : > { %2953 = vmatpush3.bf16.xpose.msra.mxu0 %v798_v38 }
 0x23b   : > { %2955 = vmatmul.mubr.msk.bf16.vlgmr.msra.gmra.mrb[8].mxu0 %vm787_vm0, %v3518_v40 }
 0x30e   : > { %v2956_v42 = vpop.f32.mrb[8].mxu0 }
 0x30f   : > { %v834_v45 = vpop.f32.mrb[9].mxu0  ;;  %v850_v46 = vmul.f32 0.17677669, %v2956_v42 }
 0x310   : > { %v848_v47 = vmul.f32 0.17677669, %v834_v45  ;;  %v2957_v48 = vpop.f32.mrb[10].mxu0 }
 0x311   : > { %v837_v49 = vpop.f32.mrb[11].mxu0  ;;  %v853_v54 = vadd.f32 %v850_v46, %v3522_v44 }
 0x312   : > { %v849_v50 = vmul.f32 0.17677669, %v837_v49  ;;  %v851_v51 = vadd.f32 %v848_v47, %v3522_v44 }
 0x313   : > { %v861_v56 = vsel %vm854_vm3, %v853_v54, -inf }
 0x314   : > { %v855_v52 = vsel %vm854_vm3, %v851_v51, -inf  ;;  %v852_v53 = vadd.f32 %v849_v50, %v3522_v44 }
 0x315   : > { %856 = vmax.xlane.f32.xlu0 %v855_v52 }
 0x316   : > { %v858_v55 = vsel %vm854_vm3, %v852_v53, -inf }
 0x317   : > { %859 = vmax.xlane.f32.xlu1 %v858_v55 }
 0x319   : > { %862 = vmax.xlane.f32.xlu0 %v861_v56 }
 0x3a2   : > { %v857_v57 = vpop.xlane.xlu0 %856 }
 0x3a3   : > { %v864_v58 = vsub.f32 %v851_v51, %v857_v57 }
 0x3a4   : > { %v860_v59 = vpop.xlane.xlu1 %859 }
 0x3a5   : > { %v867_v60 = vmul.f32 1.442695, %v864_v58  ;;  %v865_v61 = vsub.f32 %v852_v53, %v860_v59 }
 0x3a6   : > { %v863_v62 = vpop.xlane.xlu0 %862 }
 0x3a7   : > { %3198 = vpow2.f32 %v867_v60  ;;  %v869_v63 = vmul.f32 1.442695, %v865_v61  ;;  %v866_v0 = vsub.f32 %v853_v54, %v863_v62 }
 0x3a9   : > { %3200 = vpow2.f32 %v869_v63  ;;  %v871_v1 = vmul.f32 1.442695, %v866_v0 }
 0x3ab   : > { %3202 = vpow2.f32 %v871_v1 }
 0x3b1   : > { %v3199_v4 = vpop.eup %3198 }
 0x3b2   : > { %v873_v7 = vsel %vm854_vm3, %v3199_v4, 0.0 }
 0x3b3   : > { %v3201_v8 = vpop.eup %3200  ;;  %874 = vadd.xlane.f32.xlu1 %v873_v7 }
 0x3b4   : > { %v876_v9 = vsel %vm854_vm3, %v3201_v8, 0.0 }
 0x3b5   : > { %v3203_v10 = vpop.eup %3202  ;;  %877 = vadd.xlane.f32.xlu0 %v876_v9 }
 0x3b6   : > { %v879_v11 = vsel %vm854_vm3, %v3203_v10, 0.0 }
 0x3b7   : > { %880 = vadd.xlane.f32.xlu1 %v879_v11 }
 0x3c8   : > { %964 = vrot.lane.b32.xlu1 %v3510_v36, %s3289_s16 }
 0x3cb   : > { %962 = vrot.lane.b32.xlu0 %v3494_v26, %s3289_s16 }
 0x3cc   : > { %956 = vrot.lane.b32.xlu1 %v3492_v23, %s3289_s16 }
 0x3d0   : > { %958 = vrot.lane.b32.xlu1 %v3518_v40, %s3289_s16 }
 0x440   : > { %v875_v12 = vpop.xlane.xlu1 %874 }
 0x441   : > { %3204 = vrcp.f32 %v875_v12 }
 0x442   : > { %v878_v13 = vpop.xlane.xlu0 %877 }
 0x443   : > { %3206 = vrcp.f32 %v878_v13 }
 0x444   : > { %v881_v14 = vpop.xlane.xlu1 %880 }
 0x445   : > { %3208 = vrcp.f32 %v881_v14 }
 0x446   : > { %v963_v15 = vpop.permute.xlu0 %962 }
 0x447   : > { %3049 = vmatprep.subr.msk.bf16.mxu1 %vm787_vm0, %v963_v15  ;;  %v973_v28 = vsel %vm787_vm0, %v963_v15, 0 }
 0x448   : > { %v965_v18 = vpop.permute.xlu1 %964 }
 0x449   : > { %v976_v32 = vsel %vm787_vm0, %v965_v18, 0 }
 0x44b   : > { %v3205_v16 = vpop.eup %3204 }
 0x44c   : > { %v885_v19 = vmul.f32 %v3205_v16, %v3199_v4  ;;  %v957_v29 = vpop.permute.xlu1 %956 }
 0x44d   : > { %v3207_v17 = vpop.eup %3206 }
 0x44e   : > { %v886_v20 = vmul.f32 %v3207_v17, %v3201_v8 }
 0x44f   : > { %v3209_v21 = vpop.eup %3208 }
 0x450   : > { %v887_v22 = vmul.f32 %v3209_v21, %v3203_v10  ;;  %v888_v24 = vpack.c.bf16 %v886_v20, %v885_v19  ;;  %v959_v33 = vpop.permute.xlu1 %958 }
 0x452   : > { %2962 = vmatprep.mubr.msk.bf16.mxu1 %vm854_vm3, %v888_v24  ;;  %v889_v25 = vpack.c.bf16 %v887_v22, %v887_v22 }
 0x454   : > { %2963 = vmatmul.mubr.msk.bf16.vlgmr.msra.gmra.mrb[4].mxu1 %vm854_vm3, %v889_v25 }
 0x455   : > { %2967 = vmatpush3.bf16.xpose.msra.mxu1 %v973_v28  ;;  %2970 = vmatprep.mubr.msk.bf16.mxu1 %vm787_vm0, %v957_v29 }
 0x456   : > { %3050 = vmatprep.subr.msk.bf16.mxu1 %vm787_vm0, %v965_v18 }
 0x45d   : > { %2969 = vmatpush3.bf16.xpose.msra.mxu1 %v976_v32  ;;  %v3107_v32 = vld [vmem:[%s4046_s5 + $0x18] sm:$0xff]  }
 0x45e   : > { %2990 = vmatprep.subr.bf16.mxu1 %v3104_v31 }
 0x464   : > { %2971 = vmatmul.mubr.msk.bf16.vlgmr.msra.gmra.mrb[8].mxu1 %vm787_vm0, %v959_v33 }
 0x465   : > { %2991 = vmatpush3.bf16.msra.mxu1 %v3104_v31 }
 0x466   : > { %2992 = vmatprep.subr.bf16.mxu1 %v3105_v34 }
 0x469   : > { %2993 = vmatpush3.bf16.msra.mxu1 %v3105_v34 }
 0x527   : > { %v2964_v37 = vpop.f32.mrb[4].mxu1 }
 0x528   : > { %v934_v38 = vpop.f32.mrb[5].mxu1  ;;  %v949_v43 = vpack.c.bf16 %v2964_v37, %v2964_v37 }
 0x529   : > { %v2965_v39 = vpop.f32.mrb[6].mxu1 }
 0x52a   : > { %v937_v41 = vpop.f32.mrb[7].mxu1 }
 0x52b   : > { %v948_v42 = vpack.c.bf16 %v937_v41, %v934_v38 }
 0x52d   : > { %2994 = vmatprep.mubr.msk.bf16.mxu1 %vm787_vm0, %v948_v42 }
 0x52e   : > { %2995 = vmatmul.mubr.msk.bf16.vlgmr.msra.gmra.mrb[12].mxu1 %vm787_vm0, %v949_v43 }
 0x537   : > { %v2972_v45 = vpop.f32.mrb[8].mxu1 }
 0x538   : > { %v1012_v46 = vpop.f32.mrb[9].mxu1  ;;  %v1028_v47 = vmul.f32 0.17677669, %v2972_v45 }
 0x539   : > { %v1026_v48 = vmul.f32 0.17677669, %v1012_v46  ;;  %v2973_v49 = vpop.f32.mrb[10].mxu1 }
 0x53a   : > { %v1015_v50 = vpop.f32.mrb[11].mxu1  ;;  %v1031_v55 = vadd.f32 %v1028_v47, %v3522_v44 }
 0x53b   : > { %v1027_v51 = vmul.f32 0.17677669, %v1015_v50  ;;  %v1029_v52 = vadd.f32 %v1026_v48, %v3522_v44 }
 0x53c   : > { %v1038_v57 = vsel %vm854_vm3, %v1031_v55, -inf }
 0x53d   : > { %v1032_v53 = vsel %vm854_vm3, %v1029_v52, -inf  ;;  %v1030_v54 = vadd.f32 %v1027_v51, %v3522_v44 }
 0x53e   : > { %1033 = vmax.xlane.f32.xlu0 %v1032_v53 }
 0x53f   : > { %v1035_v56 = vsel %vm854_vm3, %v1030_v54, -inf }
 0x540   : > { %1036 = vmax.xlane.f32.xlu1 %v1035_v56 }
 0x542   : > { %1039 = vmax.xlane.f32.xlu0 %v1038_v57 }
 0x5cb   : > { %v1034_v58 = vpop.xlane.xlu0 %1033 }
 0x5cc   : > { %v1041_v59 = vsub.f32 %v1029_v52, %v1034_v58 }
 0x5cd   : > { %v1037_v60 = vpop.xlane.xlu1 %1036 }
 0x5ce   : > { %v1044_v61 = vmul.f32 1.442695, %v1041_v59  ;;  %v1042_v62 = vsub.f32 %v1030_v54, %v1037_v60 }
 0x5cf   : > { %v1040_v63 = vpop.xlane.xlu0 %1039 }
 0x5d0   : > { %3210 = vpow2.f32 %v1044_v61  ;;  %v1046_v0 = vmul.f32 1.442695, %v1042_v62  ;;  %v1043_v1 = vsub.f32 %v1031_v55, %v1040_v63 }
 0x5d2   : > { %3212 = vpow2.f32 %v1046_v0  ;;  %v1048_v4 = vmul.f32 1.442695, %v1043_v1 }
 0x5d4   : > { %3214 = vpow2.f32 %v1048_v4 }
 0x5da   : > { %v3211_v7 = vpop.eup %3210 }
 0x5db   : > { %v1050_v8 = vsel %vm854_vm3, %v3211_v7, 0.0 }
 0x5dc   : > { %v3213_v9 = vpop.eup %3212  ;;  %1051 = vadd.xlane.f32.xlu0 %v1050_v8 }
 0x5dd   : > { %v1053_v12 = vsel %vm854_vm3, %v3213_v9, 0.0 }
 0x5de   : > { %v3215_v10 = vpop.eup %3214 }
 0x5df   : > { %v1056_v11 = vsel %vm854_vm3, %v3215_v10, 0.0 }
 0x5e0   : > { %1057 = vadd.xlane.f32.xlu1 %v1056_v11  ;;  %1054 = vadd.xlane.f32.xlu0 %v1053_v12 }
 0x5f1   : > { %1071 = vrot.lane.b32.xlu1 %v3504_v30, %s3289_s16 }
 0x5f5   : > { %1273 = vrot.lane.b32.xlu1 %v3494_v26, %s3290_s21 }
 0x5f6   : > { %1069 = vrot.lane.b32.xlu0 %v3496_v27, %s3289_s16 }
 0x5f9   : > { %1275 = vrot.lane.b32.xlu1 %v3510_v36, %s3290_s21 }
 0x5fa   : > { %1269 = vrot.lane.b32.xlu0 %v3492_v23, %s3290_s21 }
 0x5fd   : > { %1271 = vrot.lane.b32.xlu1 %v3518_v40, %s3290_s21 }
 0x5fe   : > { %1519 = vrot.lane.b32.xlu0 %v3494_v26, %s3291_s22 }
 0x601   : > { %1521 = vrot.lane.b32.xlu1 %v3510_v36, %s3291_s22  ;;  %v3582_v13 = vpop.f32.mrb[12].mxu1 }
 0x602   : > { %1515 = vrot.lane.b32.xlu0 %v3492_v23, %s3291_s22  ;;  %v3586_v14 = vpop.f32.mrb[13].mxu1  ;;  %v3106_v23 = vld [vmem:[%s4046_s5 + $0x10] sm:$0xff]  }
 0x603   : > { %v2997_v15 = vpop.f32.mrb[14].mxu1 }
 0x604   : > { %v3588_v16 = vpop.f32.mrb[15].mxu1 }
 0x605   : > { %1517 = vrot.lane.b32.xlu1 %v3518_v40, %s3291_s22 }
 0x669   : > { %v1052_v17 = vpop.xlane.xlu0 %1051 }
 0x66a   : > { %3216 = vrcp.f32 %v1052_v17 }
 0x66d   : > { %v1055_v18 = vpop.xlane.xlu0 %1054  ;;  %v1058_v26 = vpop.xlane.xlu1 %1057 }
 0x66e   : > { %3218 = vrcp.f32 %v1055_v18 }
 0x66f   : > { %3220 = vrcp.f32 %v1058_v26 }
 0x671   : > { %v1070_v36 = vpop.permute.xlu0 %1069  ;;  %v1072_v19 = vpop.permute.xlu1 %1071 }
 0x672   : > { %2974 = vmatprep.subr.bf16.mxu0 %v1070_v36  ;;  %v1081_v21 = vsel %vm896_vm1, %v1072_v19, 0 }
 0x673   : > { %2975 = vmatpush3.bf16.msra.mxu0 %v1070_v36 }
 0x674   : > { %3051 = vmatprep.subr.msk.bf16.mxu0 %vm896_vm1, %v1072_v19  ;;  %v3217_v20 = vpop.eup %3216 }
 0x675   : > { %v1062_v24 = vmul.f32 %v3217_v20, %v3211_v7  ;;  %v1274_v33 = vpop.permute.xlu1 %1273  ;;  %v1270_v43 = vpop.permute.xlu0 %1269 }
 0x676   : > { %v1284_v45 = vsel %vm787_vm0, %v1274_v33, 0 }
 0x677   : > { %2977 = vmatpush3.bf16.msra.mxu0 %v1081_v21 }
 0x678   : > { %v3219_v40 = vpop.eup %3218  ;;  %2982 = vmatprep.subr.bf16.mxu0 %v3106_v23 }
 0x679   : > { %v3221_v22 = vpop.eup %3220  ;;  %v1063_v25 = vmul.f32 %v3219_v40, %v3213_v9  ;;  %v1276_v46 = vpop.permute.xlu1 %1275 }
 0x67a   : > { %v1064_v28 = vmul.f32 %v3221_v22, %v3215_v10  ;;  %v1287_v47 = vsel %vm787_vm0, %v1276_v46, 0  ;;  %v1520_v48 = vpop.permute.xlu0 %1519 }
 0x67b   : > { %v1065_v29 = vpack.c.bf16 %v1063_v25, %v1062_v24  ;;  %v1530_v50 = vsel %vm787_vm0, %v1520_v48, 0 }
 0x67c   : > { %v1066_v31 = vpack.c.bf16 %v1064_v28, %v1064_v28 }
 0x67d   : > { %2978 = vmatprep.mubr.msk.bf16.mxu0 %vm854_vm3, %v1065_v29  ;;  %v1272_v49 = vpop.permute.xlu1 %1271 }
 0x67e   : > { %2979 = vmatmul.mubr.msk.bf16.vlgmr.msra.gmra.mrb[12].mxu0 %vm854_vm3, %v1066_v31  ;;  %v1516_v51 = vpop.permute.xlu0 %1515 }
 0x67f   : > { %2983 = vmatpush3.bf16.msra.mxu0 %v3106_v23 }
 0x680   : > { %2984 = vmatprep.subr.bf16.mxu0 %v3107_v32 }
 0x681   : > { %v1522_v52 = vpop.permute.xlu1 %1521 }
 0x682   : > { %v1533_v53 = vsel %vm787_vm0, %v1522_v52, 0 }
 0x683   : > { %2985 = vmatpush3.bf16.msra.mxu0 %v3107_v32 }
 0x684   : > { %3052 = vmatprep.subr.msk.bf16.mxu0 %vm787_vm0, %v1274_v33 }
 0x685   : > { %v1518_v54 = vpop.permute.xlu1 %1517 }
 0x751   : > { %v2980_v34 = vpop.f32.mrb[12].mxu0 }
 0x752   : > { %v1117_v37 = vpop.f32.mrb[13].mxu0  ;;  %v1132_v42 = vpack.c.bf16 %v2980_v34, %v2980_v34 }
 0x753   : > { %v2981_v38 = vpop.f32.mrb[14].mxu0 }
 0x754   : > { %v1120_v39 = vpop.f32.mrb[15].mxu0 }
 0x755   : > { %v1131_v41 = vpack.c.bf16 %v1120_v39, %v1117_v37 }
 0x757   : > { %2986 = vmatprep.mubr.msk.bf16.mxu0 %vm787_vm0, %v1131_v41 }
 0x758   : > { %2987 = vmatmul.mubr.msk.bf16.vlgmr.msra.gmra.mrb[16].mxu0 %vm787_vm0, %v1132_v42 }
 0x759   : > { %2999 = vmatpush3.bf16.xpose.msra.mxu0 %v1284_v45  ;;  %3002 = vmatprep.mubr.msk.bf16.mxu0 %vm787_vm0, %v1270_v43 }
 0x75a   : > { %3053 = vmatprep.subr.msk.bf16.mxu0 %vm787_vm0, %v1276_v46 }
 0x761   : > { %3001 = vmatpush3.bf16.xpose.msra.mxu0 %v1287_v47 }
 0x762   : > { %3055 = vmatprep.subr.msk.bf16.mxu0 %vm787_vm0, %v1520_v48 }
 0x768   : > { %3003 = vmatmul.mubr.msk.bf16.vlgmr.msra.gmra.mrb[20].mxu0 %vm787_vm0, %v1272_v49 }
 0x769   : > { %3023 = vmatpush3.bf16.xpose.msra.mxu0 %v1530_v50  ;;  %3026 = vmatprep.mubr.msk.bf16.mxu0 %vm787_vm0, %v1516_v51 }
 0x76a   : > { %3056 = vmatprep.subr.msk.bf16.mxu0 %vm787_vm0, %v1522_v52 }
 0x771   : > { %3025 = vmatpush3.bf16.xpose.msra.mxu0 %v1533_v53 }
 0x778   : > { %3027 = vmatmul.mubr.msk.bf16.vlgmr.msra.gmra.mrb[24].mxu0 %vm787_vm0, %v1518_v54 }
 0x779   : > { %2075 = vmatprep.mubr.bf16.mxu0 %v3287_v35 }
 0x82b   : > { %v2988_v55 = vpop.f32.mrb[16].mxu0 }
 0x82c   : > { %v3618_v56 = vadd.f32 %v3582_v13, %v2988_v55  ;;  %v1189_v57 = vpop.f32.mrb[17].mxu0 }
 0x82d   : > { %v3621_v58 = vadd.f32 %v3586_v14, %v1189_v57  ;;  %v2989_v59 = vpop.f32.mrb[18].mxu0 }
 0x82e   : > { %v1192_v60 = vpop.f32.mrb[19].mxu0 }
 0x82f   : > { %v3624_v61 = vadd.f32 %v3588_v16, %v1192_v60 }
 0x83b   : > { %v3004_v62 = vpop.f32.mrb[20].mxu0 }
 0x83c   : > { %v1323_v63 = vpop.f32.mrb[21].mxu0  ;;  %v1339_v0 = vmul.f32 0.17677669, %v3004_v62 }
 0x83d   : > { %v1337_v1 = vmul.f32 0.17677669, %v1323_v63  ;;  %v3005_v4 = vpop.f32.mrb[22].mxu0 }
 0x83e   : > { %v1326_v7 = vpop.f32.mrb[23].mxu0  ;;  %v1342_v12 = vadd.f32 %v1339_v0, %v3522_v44 }
 0x83f   : > { %v1338_v8 = vmul.f32 0.17677669, %v1326_v7  ;;  %v1340_v9 = vadd.f32 %v1337_v1, %v3522_v44 }
 0x840   : > { %v1349_v14 = vsel %vm854_vm3, %v1342_v12, -inf }
 0x841   : > { %v1343_v10 = vsel %vm854_vm3, %v1340_v9, -inf  ;;  %v1341_v11 = vadd.f32 %v1338_v8, %v3522_v44 }
 0x842   : > { %1344 = vmax.xlane.f32.xlu0 %v1343_v10 }
 0x843   : > { %v1346_v13 = vsel %vm854_vm3, %v1341_v11, -inf }
 0x844   : > { %1347 = vmax.xlane.f32.xlu1 %v1346_v13 }
 0x846   : > { %1350 = vmax.xlane.f32.xlu0 %v1349_v14 }
 0x84b   : > { %v3028_v15 = vpop.f32.mrb[24].mxu0 }
 0x84c   : > { %v1569_v16 = vpop.f32.mrb[25].mxu0  ;;  %v1585_v38 = vmul.f32 0.17677669, %v3028_v15 }
 0x84d   : > { %v3029_v17 = vpop.f32.mrb[26].mxu0  ;;  %v1583_v34 = vmul.f32 0.17677669, %v1569_v16 }
 0x84e   : > { %v1572_v18 = vpop.f32.mrb[27].mxu0  ;;  %v1588_v45 = vadd.f32 %v1585_v38, %v3522_v44 }
 0x84f   : > { %v1584_v37 = vmul.f32 0.17677669, %v1572_v18  ;;  %v1586_v39 = vadd.f32 %v1583_v34, %v3522_v44 }
 0x850   : > { %v1595_v46 = vsel %vm854_vm3, %v1588_v45, -inf }
 0x851   : > { %v1587_v41 = vadd.f32 %v1584_v37, %v3522_v44  ;;  %v1589_v42 = vsel %vm854_vm3, %v1586_v39, -inf  ;;  %v3108_v44 = vld [vmem:[%s4046_s5 + $0x20] sm:$0xff]  }
 0x853   : > { %v1592_v43 = vsel %vm854_vm3, %v1587_v41, -inf }
 0x8cf   : > { %v1345_v26 = vpop.xlane.xlu0 %1344 }
 0x8d0   : > { %v1352_v36 = vsub.f32 %v1340_v9, %v1345_v26  ;;  %v3109_v26 = vld [vmem:[%s4046_s5 + $0x28] sm:$0xff]  }
 0x8d1   : > { %v1348_v19 = vpop.xlane.xlu1 %1347 }
 0x8d2   : > { %v1355_v23 = vmul.f32 1.442695, %v1352_v36  ;;  %v1353_v20 = vsub.f32 %v1341_v11, %v1348_v19 }
 0x8d3   : > { %v1351_v21 = vpop.xlane.xlu0 %1350 }
 0x8d4   : > { %3222 = vpow2.f32 %v1355_v23  ;;  %v1357_v40 = vmul.f32 1.442695, %v1353_v20  ;;  %v1354_v22 = vsub.f32 %v1342_v12, %v1351_v21 }
 0x8d6   : > { %3224 = vpow2.f32 %v1357_v40  ;;  %v1359_v24 = vmul.f32 1.442695, %v1354_v22 }
 0x8d8   : > { %3226 = vpow2.f32 %v1359_v24 }
 0x8de   : > { %v3223_v25 = vpop.eup %3222 }
 0x8df   : > { %v1361_v28 = vsel %vm854_vm3, %v3223_v25, 0.0 }
 0x8e0   : > { %v3225_v29 = vpop.eup %3224  ;;  %1362 = vadd.xlane.f32.xlu0 %v1361_v28 }
 0x8e1   : > { %v1364_v33 = vsel %vm854_vm3, %v3225_v29, 0.0 }
 0x8e2   : > { %v3227_v31 = vpop.eup %3226 }
 0x8e3   : > { %v1367_v32 = vsel %vm854_vm3, %v3227_v31, 0.0 }
 0x8e4   : > { %1368 = vadd.xlane.f32.xlu1 %v1367_v32  ;;  %1365 = vadd.xlane.f32.xlu0 %v1364_v33 }
 0x8f5   : > { %1380 = vrot.lane.b32.xlu1 %v3504_v30, %s3290_s21 }
 0x8fa   : > { %1378 = vrot.lane.b32.xlu0 %v3496_v27, %s3290_s21 }
 0x919   : > { %1590 = vmax.xlane.f32.xlu1 %v1589_v42  ;;  %1593 = vmax.xlane.f32.xlu0 %v1592_v43  ;;  %v3111_v42 = vld [vmem:[%s4046_s5 + $0x38] sm:$0xff]  }
 0x91d   : > { %1596 = vmax.xlane.f32.xlu0 %v1595_v46 }
 0x96d   : > { %v1363_v47 = vpop.xlane.xlu0 %1362 }
 0x96e   : > { %3228 = vrcp.f32 %v1363_v47 }
 0x971   : > { %v1366_v48 = vpop.xlane.xlu0 %1365  ;;  %v1369_v49 = vpop.xlane.xlu1 %1368 }
 0x972   : > { %3230 = vrcp.f32 %v1366_v48 }
 0x973   : > { %3232 = vrcp.f32 %v1369_v49 }
 0x975   : > { %v1379_v50 = vpop.permute.xlu0 %1378  ;;  %v1381_v51 = vpop.permute.xlu1 %1380 }
 0x976   : > { %3006 = vmatprep.subr.bf16.mxu1 %v1379_v50  ;;  %v1390_v53 = vsel %vm896_vm1, %v1381_v51, 0 }
 0x977   : > { %3007 = vmatpush3.bf16.msra.mxu1 %v1379_v50 }
 0x978   : > { %3054 = vmatprep.subr.msk.bf16.mxu1 %vm896_vm1, %v1381_v51  ;;  %v3229_v52 = vpop.eup %3228 }
 0x979   : > { %v1373_v57 = vmul.f32 %v3229_v52, %v3223_v25 }
 0x97b   : > { %3009 = vmatpush3.bf16.msra.mxu1 %v1390_v53 }
 0x97c   : > { %v3231_v54 = vpop.eup %3230  ;;  %3014 = vmatprep.subr.bf16.mxu1 %v3108_v44 }
 0x97d   : > { %v3233_v55 = vpop.eup %3232  ;;  %v1374_v59 = vmul.f32 %v3231_v54, %v3225_v29 }
 0x97e   : > { %v1375_v60 = vmul.f32 %v3233_v55, %v3227_v31 }
 0x97f   : > { %v1376_v62 = vpack.c.bf16 %v1374_v59, %v1373_v57 }
 0x980   : > { %v1377_v63 = vpack.c.bf16 %v1375_v60, %v1375_v60 }
 0x981   : > { %3010 = vmatprep.mubr.msk.bf16.mxu1 %vm854_vm3, %v1376_v62  ;;  %v2746_v62 = vld [vmem:[%s4047_s6] ss:$0 sm:$0xff] }
 0x982   : > { %3011 = vmatmul.mubr.msk.bf16.vlgmr.msra.gmra.mrb[16].mxu1 %vm854_vm3, %v1377_v63  ;;  %v3276_v63 = vld [vmem:[%s3378_s30] sm:$0xff] }
 0x983   : > { %3015 = vmatpush3.bf16.msra.mxu1 %v3108_v44 }
 0x984   : > { %3016 = vmatprep.subr.bf16.mxu1 %v3109_v26 }
 0x987   : > { %3017 = vmatpush3.bf16.msra.mxu1 %v3109_v26  ;;  %v3118_v26 = vld [vmem:[%s4050_s9 + $0x20] ss:$16 sps:$4 sm:$0xff]  }
 0x9a6   : > { %v1594_v0 = vpop.xlane.xlu0 %1593  ;;  %v1591_v1 = vpop.xlane.xlu1 %1590 }
 0x9a7   : > { %v1599_v4 = vsub.f32 %v1587_v41, %v1594_v0  ;;  %v1598_v8 = vsub.f32 %v1586_v39, %v1591_v1  ;;  %v3110_v41 = vld [vmem:[%s4046_s5 + $0x30] sm:$0xff]  }
 0x9a9   : > { %v1603_v7 = vmul.f32 1.442695, %v1599_v4  ;;  %v1601_v11 = vmul.f32 1.442695, %v1598_v8  ;;  %v3277_v4 = vld [vmem:[%s3378_s30 + $0x8] sm:$0xff] }
 0x9aa   : > { %v1597_v9 = vpop.xlane.xlu0 %1596 }
 0x9ab   : > { %3234 = vpow2.f32 %v1603_v7  ;;  %v1600_v10 = vsub.f32 %v1588_v45, %v1597_v9  ;;  %v3278_v9 = vld [vmem:[%s3378_s30 + $0x10] sm:$0xff] }
 0x9ad   : > { %v1605_v12 = vmul.f32 1.442695, %v1600_v10 }
 0x9af   : > { %3236 = vpow2.f32 %v1605_v12 }
 0x9b0   : > { %3238 = vpow2.f32 %v1601_v11 }
 0x9b5   : > { %v3235_v13 = vpop.eup %3234 }
 0x9b6   : > { %v1610_v14 = vsel %vm854_vm3, %v3235_v13, 0.0 }
 0x9b7   : > { %1611 = vadd.xlane.f32.xlu0 %v1610_v14  ;;  %v3114_v14 = vld [vmem:[%s4050_s9 + $0x4] ss:$16 sps:$4 sm:$0xff]  }
 0x9b8   : > { %2043 = vmatprep.subr.bf16.mxu0 %v3114_v14 }
 0x9b9   : > { %v3237_v15 = vpop.eup %3236 }
 0x9ba   : > { %v1613_v16 = vsel %vm854_vm3, %v3237_v15, 0.0  ;;  %v3239_v17 = vpop.eup %3238 }
 0x9bb   : > { %1614 = vadd.xlane.f32.xlu1 %v1613_v16  ;;  %v1607_v18 = vsel %vm854_vm3, %v3239_v17, 0.0  ;;  %v3117_v16 = vld [vmem:[%s4050_s9 + $0xc] ss:$16 sps:$4 sm:$0xff]  }
 0x9bf   : > { %1608 = vadd.xlane.f32.xlu1 %v1607_v18  ;;  %v3123_v18 = vld [vmem:[%s4050_s9 + $0x2c] ss:$16 sps:$4 sm:$0xff]  }
 0x9cd   : > { %1624 = vrot.lane.b32.xlu0 %v3496_v27, %s3291_s22 }
 0x9d0   : > { %1626 = vrot.lane.b32.xlu1 %v3504_v30, %s3291_s22  ;;  %s440_s22 = scalar_lea.vmem %s4054_s13, %s3058_s27 }
 0xa44   : > { %v1612_v36 = vpop.xlane.xlu0 %1611 }
 0xa45   : > { %3240 = vrcp.f32 %v1612_v36  ;;  %v3121_v36 = vld [vmem:[%s4050_s9 + $0x28] ss:$16 sps:$4 sm:$0xff]  }
 0xa48   : > { %v1625_v19 = vpop.permute.xlu0 %1624  ;;  %v1615_v23 = vpop.xlane.xlu1 %1614 }
 0xa49   : > { %3030 = vmatprep.subr.bf16.mxu1 %v1625_v19 }
 0xa4c   : > { %v1609_v20 = vpop.xlane.xlu1 %1608 }
 0xa4d   : > { %3242 = vrcp.f32 %v1609_v20 }
 0xa4e   : > { %3244 = vrcp.f32 %v1615_v23 }
 0xa4f   : > { %v3241_v21 = vpop.eup %3240 }
 0xa50   : > { %v1620_v31 = vmul.f32 %v3241_v21, %v3235_v13  ;;  %v1627_v34 = vpop.permute.xlu1 %1626  ;;  %v3112_v13 = vld [vmem:[%s4050_s9] ss:$16 sps:$4 sm:$0xff]  }
 0xa51   : > { %v1636_v38 = vsel %vm896_vm1, %v1627_v34, 0  ;;  %2044 = vmatpush1.bf16.msra.mxu0 %v3112_v13 }
 0xa55   : > { %v3012_v40 = vpop.f32.mrb[16].mxu1 }
 0xa56   : > { %v1426_v22 = vpop.f32.mrb[17].mxu1  ;;  %v1441_v32 = vpack.c.bf16 %v3012_v40, %v3012_v40 }
 0xa57   : > { %v3243_v24 = vpop.eup %3242  ;;  %v3013_v25 = vpop.f32.mrb[18].mxu1 }
 0xa58   : > { %v1429_v28 = vpop.f32.mrb[19].mxu1  ;;  %v1619_v29 = vmul.f32 %v3243_v24, %v3239_v17  ;;  %v3245_v30 = vpop.eup %3244  ;;  %v3120_v17 = vld [vmem:[%s4050_s9 + $0x24] ss:$16 sps:$4 sm:$0xff]  }
 0xa59   : > { %v1440_v27 = vpack.c.bf16 %v1429_v28, %v1426_v22  ;;  %v1621_v37 = vmul.f32 %v3245_v30, %v3237_v15  ;;  %v3115_v15 = vld [vmem:[%s4050_s9 + $0x8] ss:$16 sps:$4 sm:$0xff]   ;;  %2045 = vmatprep.subr.bf16.mxu0 %v3120_v17  ;;  %v3124_v30 = vld [vmem:[%s4050_s9 + $0x40] ss:$16 sps:$4 sm:$0xff]  }
 0xa5a   : > { %v1622_v33 = vpack.c.bf16 %v1620_v31, %v1619_v29  ;;  %2046 = vmatpush1.bf16.msra.mxu0 %v3118_v26 }
 0xa5b   : > { %3018 = vmatprep.mubr.msk.bf16.mxu1 %vm787_vm0, %v1440_v27  ;;  %v1623_v39 = vpack.c.bf16 %v1621_v37, %v1621_v37  ;;  %v3132_v37 = vld [vmem:[%s4050_s9 + $0x64] ss:$16 sps:$4 sm:$0xff]  }
 0xa5c   : > { %3019 = vmatmul.mubr.msk.bf16.vlgmr.msra.gmra.mrb[20].mxu1 %vm787_vm0, %v1441_v32  ;;  %v3126_v32 = vld [vmem:[%s4050_s9 + $0x44] ss:$16 sps:$4 sm:$0xff]  }
 0xa5d   : > { %3031 = vmatpush3.bf16.msra.mxu1 %v1625_v19  ;;  %3034 = vmatprep.mubr.msk.bf16.mxu1 %vm854_vm3, %v1622_v33  ;;  %v3129_v33 = vld [vmem:[%s4050_s9 + $0x4c] ss:$16 sps:$4 sm:$0xff]  }
 0xa5e   : > { %3057 = vmatprep.subr.msk.bf16.mxu1 %vm896_vm1, %v1627_v34  ;;  %v3127_v34 = vld [vmem:[%s4050_s9 + $0x48] ss:$16 sps:$4 sm:$0xff]   ;;  %2047 = vmatprep.subr.bf16.mxu0 %v3126_v32  ;;  %v3168_v32 = vld [vmem:[%s4052_s11 + $0x50] sm:$0xff]  }
 0xa5f   : > { %2048 = vmatpush1.bf16.msra.mxu0 %v3124_v30  ;;  %v3170_v30 = vld [vmem:[%s4052_s11 + $0x10] sm:$0xff]  }
 0xa60   : > { %2049 = vmatprep.subr.bf16.mxu0 %v3132_v37  ;;  %v3172_v37 = vld [vmem:[%s4052_s11 + $0x58] sm:$0xff]  }
 0xa61   : > { %3033 = vmatpush3.bf16.msra.mxu1 %v1636_v38  ;;  %v3135_v38 = vld [vmem:[%s4050_s9 + $0x6c] ss:$16 sps:$4 sm:$0xff]  }
 0xa62   : > { %3038 = vmatprep.subr.bf16.mxu1 %v3110_v41 }
 0xa64   : > { %3035 = vmatmul.mubr.msk.bf16.vlgmr.msra.gmra.mrb[24].mxu1 %vm854_vm3, %v1623_v39  ;;  %v3130_v39 = vld [vmem:[%s4050_s9 + $0x60] ss:$16 sps:$4 sm:$0xff]  }
 0xa65   : > { %3039 = vmatpush3.bf16.msra.mxu1 %v3110_v41  ;;  %v3133_v41 = vld [vmem:[%s4050_s9 + $0x68] ss:$16 sps:$4 sm:$0xff]   ;;  %2050 = vmatpush1.bf16.msra.mxu0 %v3130_v39 }
 0xa66   : > { %3040 = vmatprep.subr.bf16.mxu1 %v3111_v42  ;;  %v3174_v39 = vld [vmem:[%s4052_s11 + $0x18] sm:$0xff]  }
 0xa69   : > { %3041 = vmatpush3.bf16.msra.mxu1 %v3111_v42  ;;  %v3138_v42 = vld [vmem:[%s4050_s9 + $0x84] ss:$16 sps:$4 sm:$0xff]  }
 0xa6a   : > { %2094 = vmatprep.subr.bf16.mxu1 %v3117_v16  ;;  %2051 = vmatprep.subr.bf16.mxu0 %v3138_v42  ;;  %v2748_v16 = vld [vmem:[%s4049_s8] ss:$0 sm:$0xff] }
 0xa6b   : > { %v3176_v42 = vld [vmem:[%s4052_s11 + $0x60] sm:$0xff]  }
 0xb2f   : > { %v3020_v43 = vpop.f32.mrb[20].mxu1 }
 0xb30   : > { %v1514_v45 = vadd.f32 %v3020_v43, %v3618_v56  ;;  %v1498_v46 = vpop.f32.mrb[21].mxu1  ;;  %v3141_v43 = vld [vmem:[%s4050_s9 + $0x8c] ss:$16 sps:$4 sm:$0xff]  }
 0xb31   : > { %v1512_v47 = vadd.f32 %v1498_v46, %v3621_v58  ;;  %v3021_v48 = vpop.f32.mrb[22].mxu1  ;;  %v3139_v46 = vld [vmem:[%s4050_s9 + $0x88] ss:$16 sps:$4 sm:$0xff]  }
 0xb32   : > { %v1501_v49 = vpop.f32.mrb[23].mxu1  ;;  %v3147_v48 = vld [vmem:[%s4050_s9 + $0xac] ss:$16 sps:$4 sm:$0xff]  }
 0xb33   : > { %v1513_v50 = vadd.f32 %v1501_v49, %v3624_v61  ;;  %v3142_v49 = vld [vmem:[%s4050_s9 + $0xa0] ss:$16 sps:$4 sm:$0xff]  }
 0xb37   : > { %v3036_v51 = vpop.f32.mrb[24].mxu1 }
 0xb38   : > { %v1672_v44 = vpop.f32.mrb[25].mxu1  ;;  %v1687_v55 = vpack.c.bf16 %v3036_v51, %v3036_v51  ;;  %v3150_v51 = vld [vmem:[%s4050_s9 + $0xc4] ss:$16 sps:$4 sm:$0xff]  }
 0xb39   : > { %v3037_v52 = vpop.f32.mrb[26].mxu1 }
 0xb3a   : > { %v1675_v53 = vpop.f32.mrb[27].mxu1  ;;  %v3148_v52 = vld [vmem:[%s4050_s9 + $0xc0] ss:$16 sps:$4 sm:$0xff]  }
 0xb3b   : > { %v1686_v54 = vpack.c.bf16 %v1675_v53, %v1672_v44  ;;  %v3153_v44 = vld [vmem:[%s4050_s9 + $0xcc] ss:$16 sps:$4 sm:$0xff]   ;;  %v3151_v53 = vld [vmem:[%s4050_s9 + $0xc8] ss:$16 sps:$4 sm:$0xff]  }
 0xb3d   : > { %3042 = vmatprep.mubr.msk.bf16.mxu1 %vm787_vm0, %v1686_v54  ;;  %v3156_v54 = vld [vmem:[%s4050_s9 + $0xe4] ss:$16 sps:$4 sm:$0xff]  }
 0xb3e   : > { %3043 = vmatmul.mubr.msk.bf16.vlgmr.msra.gmra.mrb[28].mxu1 %vm787_vm0, %v1687_v55  ;;  %v3159_v55 = vld [vmem:[%s4050_s9 + $0xec] ss:$16 sps:$4 sm:$0xff]  }
 0xb3f   : > { %2126 = vmatprep.mubr.bf16.mxu1 %v3287_v35  ;;  %2095 = vmatpush1.bf16.msra.mxu1 %v3115_v15 }
 0xb40   : > { %2096 = vmatprep.subr.bf16.mxu1 %v3123_v18 }
 0xb43   : > { %2097 = vmatpush1.bf16.msra.mxu1 %v3121_v36 }
 0xb44   : > { %2098 = vmatprep.subr.bf16.mxu1 %v3129_v33  ;;  %v3169_v33 = vld [vmem:[%s4052_s11 + $0xd0] sm:$0xff]  }
 0xb47   : > { %2099 = vmatpush1.bf16.msra.mxu1 %v3127_v34  ;;  %v3171_v34 = vld [vmem:[%s4052_s11 + $0x90] sm:$0xff]  }
 0xb48   : > { %2100 = vmatprep.subr.bf16.mxu1 %v3135_v38  ;;  %v3173_v38 = vld [vmem:[%s4052_s11 + $0xd8] sm:$0xff]  }
 0xb4b   : > { %2101 = vmatpush1.bf16.msra.mxu1 %v3133_v41  ;;  %v3175_v41 = vld [vmem:[%s4052_s11 + $0x98] sm:$0xff]  }
 0xb4c   : > { %2102 = vmatprep.subr.bf16.mxu1 %v3141_v43  ;;  %v3177_v43 = vld [vmem:[%s4052_s11 + $0xe0] sm:$0xff]  }
 0xb4f   : > { %2103 = vmatpush1.bf16.msra.mxu1 %v3139_v46  ;;  %v3179_v46 = vld [vmem:[%s4052_s11 + $0xa0] sm:$0xff]  }
 0xb50   : > { %2104 = vmatprep.subr.bf16.mxu1 %v3147_v48  ;;  %v3181_v48 = vld [vmem:[%s4052_s11 + $0xe8] sm:$0xff]  }
 0xc11   : > { %v3044_v56 = vpop.f32.mrb[28].mxu1 }
 0xc12   : > { %v1760_v58 = vadd.f32 %v3044_v56, %v1514_v45  ;;  %v1744_v57 = vpop.f32.mrb[29].mxu1  ;;  %v3136_v45 = vld [vmem:[%s4050_s9 + $0x80] ss:$16 sps:$4 sm:$0xff]  }
 0xc13   : > { %v1758_v59 = vadd.f32 %v1744_v57, %v1512_v47  ;;  %v3045_v61 = vpop.f32.mrb[30].mxu1  ;;  %2052 = vmatpush1.bf16.msra.mxu0 %v3136_v45  ;;  %v3144_v47 = vld [vmem:[%s4050_s9 + $0xa4] ss:$16 sps:$4 sm:$0xff]   ;;  %v3154_v56 = vld [vmem:[%s4050_s9 + $0xe0] ss:$16 sps:$4 sm:$0xff]  }
 0xc14   : > { %v1747_v60 = vpop.f32.mrb[31].mxu1  ;;  %v1763_v10 = vadd.f32 %v3278_v9, %v1760_v58  ;;  %2053 = vmatprep.subr.bf16.mxu0 %v3144_v47  ;;  %v3157_v58 = vld [vmem:[%s4050_s9 + $0xe8] ss:$16 sps:$4 sm:$0xff]   ;;  %v2747_v9 = vld [vmem:[%s4048_s7] ss:$0 sm:$0xff] }
 0xc15   : > { %v1761_v0 = vadd.f32 %v3276_v63, %v1758_v59  ;;  %v1759_v1 = vadd.f32 %v1747_v60, %v1513_v50  ;;  %v3145_v50 = vld [vmem:[%s4050_s9 + $0xa8] ss:$16 sps:$4 sm:$0xff]   ;;  %v3178_v45 = vld [vmem:[%s4052_s11 + $0x20] sm:$0xff]  }
 0xc16   : > { %v3692_v12 = vadd.f32 %v2746_v62, %v1763_v10  ;;  %2105 = vmatpush1.bf16.msra.mxu1 %v3145_v50  ;;  %v3180_v47 = vld [vmem:[%s4052_s11 + $0x68] sm:$0xff]  }
 0xc17   : > { %v1762_v7 = vadd.f32 %v3277_v4, %v1759_v1  ;;  %v3685_v8 = vadd.f32 %v2746_v62, %v1761_v0  ;;  %2054 = vmatpush1.bf16.msra.mxu0 %v3142_v49  ;;  %2106 = vmatprep.subr.bf16.mxu1 %v3153_v44  ;;  %v3182_v49 = vld [vmem:[%s4052_s11 + $0x28] sm:$0xff]   ;;  %v3185_v44 = vld [vmem:[%s4052_s11 + $0xf0] sm:$0xff]  }
 0xc18   : > { %2055 = vmatprep.subr.bf16.mxu0 %v3150_v51  ;;  %v3183_v50 = vld [vmem:[%s4052_s11 + $0xa8] sm:$0xff]   ;;  %v3184_v51 = vld [vmem:[%s4052_s11 + $0x70] sm:$0xff]  }
 0xc19   : > { %1776 = vadd.xlane.f32.xlu1 %v3685_v8  ;;  %v3689_v11 = vadd.f32 %v2746_v62, %v1762_v7 }
 0xc1a   : > { %2107 = vmatpush1.bf16.msra.mxu1 %v3151_v53  ;;  %v3187_v53 = vld [vmem:[%s4052_s11 + $0xb0] sm:$0xff]  }
 0xc1b   : > { %1778 = vadd.xlane.f32.xlu0 %v3689_v11  ;;  %2056 = vmatpush1.bf16.msra.mxu0 %v3148_v52  ;;  %v3186_v52 = vld [vmem:[%s4052_s11 + $0x30] sm:$0xff]  }
 0xc1c   : > { %2057 = vmatprep.subr.bf16.mxu0 %v3156_v54  ;;  %2108 = vmatprep.subr.bf16.mxu1 %v3159_v55  ;;  %v3188_v54 = vld [vmem:[%s4052_s11 + $0x78] sm:$0xff]  }
 0xc1d   : > { %v3189_v55 = vld [vmem:[%s4052_s11 + $0xf8] sm:$0xff]  }
 0xc1e   : > { %2109 = vmatpush1.bf16.msra.mxu1 %v3157_v58  ;;  %v3191_v58 = vld [vmem:[%s4052_s11 + $0xb8] sm:$0xff]  }
 0xc1f   : > { %1780 = vadd.xlane.f32.xlu0 %v3692_v12  ;;  %2058 = vmatpush1.bf16.msra.mxu0 %v3154_v56  ;;  %v3190_v56 = vld [vmem:[%s4052_s11 + $0x38] sm:$0xff]  }
 0xca6   : > { %v1777_v19 = vpop.xlane.xlu1 %1776 }
 0xca7   : > { %v1782_v23 = vmul.f32 0.0078125, %v1777_v19 }
 0xca8   : > { %v1779_v20 = vpop.xlane.xlu0 %1778 }
 0xca9   : > { %v3720_v21 = vsub.f32 %v3685_v8, %v1782_v23  ;;  %v1783_v40 = vmul.f32 0.0078125, %v1779_v20 }
 0xcab   : > { %v3723_v22 = vsub.f32 %v3689_v11, %v1783_v40  ;;  %v1788_v24 = vmul.f32 %v3720_v21, %v3720_v21 }
 0xcac   : > { %v1781_v25 = vpop.xlane.xlu0 %1780 }
 0xcad   : > { %v1784_v28 = vmul.f32 0.0078125, %v1781_v25  ;;  %1791 = vadd.xlane.f32.xlu1 %v1788_v24  ;;  %v1789_v29 = vmul.f32 %v3723_v22, %v3723_v22  ;;  %v3161_v24 = vld [vmem:[%s4052_s11 + $0xc0] sm:$0xff]  }
 0xcae   : > { %v3162_v25 = vld [vmem:[%s4052_s11] sm:$0xff]   ;;  %2902 = vmatprep.subr.bf16.mxu1 %v3161_v24 }
 0xcaf   : > { %v3730_v31 = vsub.f32 %v3692_v12, %v1784_v28  ;;  %1793 = vadd.xlane.f32.xlu0 %v1789_v29  ;;  %v3164_v28 = vld [vmem:[%s4052_s11 + $0x48] sm:$0xff]  }
 0xcb0   : > { %v3165_v29 = vld [vmem:[%s4052_s11 + $0xc8] sm:$0xff]  }
 0xcb1   : > { %v1790_v27 = vmul.f32 %v3730_v31, %v3730_v31 }
 0xcb3   : > { %1795 = vadd.xlane.f32.xlu1 %v1790_v27  ;;  %v3167_v27 = vld [vmem:[%s4052_s11 + $0x88] sm:$0xff]  }
 0xd3a   : > { %v1792_v57 = vpop.xlane.xlu1 %1791 }
 0xd3b   : > { %v1797_v59 = vmul.f32 0.0078125, %v1792_v57  ;;  %v1861_v57 = vld [vmem:[%s4051_s10] sm:$0xf] }
 0xd3c   : > { %v1794_v61 = vpop.xlane.xlu0 %1793 }
 0xd3d   : > { %v1800_v60 = vadd.f32 1e-06, %v1797_v59  ;;  %v1798_v62 = vmul.f32 0.0078125, %v1794_v61  ;;  %v1877_v59 = vsub.s32 3, %v3478_v2  ;;  %v3919_v61 = vrot.slane %v1861_v57, %v537_v3 }
 0xd3f   : > { %3246 = vrsqrt.f32 %v1800_v60  ;;  %v1801_v63 = vadd.f32 1e-06, %v1798_v62  ;;  %v3923_v60 = vrot.slane %v1861_v57, %v545_v6  ;;  %v3927_v62 = vrot.slane %v1861_v57, %v541_v5 }
 0xd40   : > { %v1796_v0 = vpop.xlane.xlu1 %1795 }
 0xd41   : > { %3248 = vrsqrt.f32 %v1801_v63  ;;  %v1799_v1 = vmul.f32 0.0078125, %v1796_v0  ;;  %v3929_v63 = vrot.slane %v1861_v57, %v1877_v59 }
 0xd43   : > { %v1802_v4 = vadd.f32 1e-06, %v1799_v1 }
 0xd45   : > { %3250 = vrsqrt.f32 %v1802_v4 }
 0xd49   : > { %v3247_v7 = vpop.eup %3246 }
 0xd4a   : > { %v1806_v10 = vmul.f32 %v3247_v7, %v3720_v21 }
 0xd4b   : > { %v3249_v13 = vpop.eup %3248 }
 0xd4c   : > { %v1807_v14 = vmul.f32 %v3249_v13, %v3723_v22  ;;  %v1815_v15 = vmul.f32 %v2747_v9, %v1806_v10  ;;  %v3160_v22 = vld [vmem:[%s4052_s11 + $0x40] sm:$0xff]  }
 0xd4d   : > { %2874 = vmatprep.subr.bf16.mxu0 %v3160_v22 }
 0xd4e   : > { %v1816_v17 = vmul.f32 %v2747_v9, %v1807_v14  ;;  %v1824_v26 = vadd.f32 %v2748_v16, %v1815_v15 }
 0xd4f   : > { %v3251_v18 = vpop.eup %3250 }
 0xd50   : > { %v1825_v36 = vadd.f32 %v2748_v16, %v1816_v17  ;;  %v1808_v19 = vmul.f32 %v3251_v18, %v3730_v31  ;;  %v3166_v31 = vld [vmem:[%s4052_s11 + $0x8] sm:$0xff]  }
 0xd52   : > { %v1827_v23 = vpack.c.bf16 %v1825_v36, %v1824_v26  ;;  %v1817_v20 = vmul.f32 %v2747_v9, %v1808_v19 }
 0xd54   : > { %2076 = vmatmul.mubr.bf16.vlgmr.msra.gmra.mrb[28].mxu0 %v1827_v23  ;;  %2127 = vmatmul.mubr.bf16.vlgmr.msra.gmra.mrb[32].mxu1 %v1827_v23  ;;  %v1826_v21 = vadd.f32 %v2748_v16, %v1817_v20 }
 0xd55   : > { %2085 = vmatprep.mubr.bf16.mxu0 %v3287_v35  ;;  %2136 = vmatprep.mubr.bf16.mxu1 %v3287_v35  ;;  %v3163_v35 = vld [vmem:[%s4052_s11 + $0x80] sm:$0xff]  }
 0xd56   : > { %v1828_v40 = vpack.c.bf16 %v1826_v21, %v1826_v21  ;;  %2875 = vmatpush3.bf16.msra.mxu0 %v3162_v25  ;;  %2903 = vmatpush3.bf16.msra.mxu1 %v3163_v35 }
 0xd57   : > { %2876 = vmatprep.subr.bf16.mxu0 %v3164_v28  ;;  %2904 = vmatprep.subr.bf16.mxu1 %v3165_v29 }
 0xd5a   : > { %2877 = vmatpush3.bf16.msra.mxu0 %v3166_v31  ;;  %2905 = vmatpush3.bf16.msra.mxu1 %v3167_v27 }
 0xd5b   : > { %2878 = vmatprep.subr.bf16.mxu0 %v3168_v32  ;;  %2906 = vmatprep.subr.bf16.mxu1 %v3169_v33 }
 0xd5c   : > { %2086 = vmatmul.mubr.bf16.gmra.mrb[32].mxu0 %v1828_v40  ;;  %2137 = vmatmul.mubr.bf16.gmra.mrb[36].mxu1 %v1828_v40 }
 0xd5e   : > { %2879 = vmatpush3.bf16.msra.mxu0 %v3170_v30  ;;  %2907 = vmatpush3.bf16.msra.mxu1 %v3171_v34 }
 0xd5f   : > { %2880 = vmatprep.subr.bf16.mxu0 %v3172_v37  ;;  %2908 = vmatprep.subr.bf16.mxu1 %v3173_v38 }
 0xd62   : > { %2881 = vmatpush3.bf16.msra.mxu0 %v3174_v39  ;;  %2909 = vmatpush3.bf16.msra.mxu1 %v3175_v41 }
 0xd63   : > { %2882 = vmatprep.subr.bf16.mxu0 %v3176_v42  ;;  %2910 = vmatprep.subr.bf16.mxu1 %v3177_v43 }
 0xd66   : > { %2883 = vmatpush3.bf16.msra.mxu0 %v3178_v45  ;;  %2911 = vmatpush3.bf16.msra.mxu1 %v3179_v46 }
 0xd67   : > { %2884 = vmatprep.subr.bf16.mxu0 %v3180_v47  ;;  %2912 = vmatprep.subr.bf16.mxu1 %v3181_v48 }
 0xd6a   : > { %2885 = vmatpush3.bf16.msra.mxu0 %v3182_v49  ;;  %2913 = vmatpush3.bf16.msra.mxu1 %v3183_v50 }
 0xd6b   : > { %2886 = vmatprep.subr.bf16.mxu0 %v3184_v51  ;;  %2914 = vmatprep.subr.bf16.mxu1 %v3185_v44 }
 0xd6e   : > { %2887 = vmatpush3.bf16.msra.mxu0 %v3186_v52  ;;  %2915 = vmatpush3.bf16.msra.mxu1 %v3187_v53 }
 0xd6f   : > { %2888 = vmatprep.subr.bf16.mxu0 %v3188_v54  ;;  %2916 = vmatprep.subr.bf16.mxu1 %v3189_v55 }
 0xd72   : > { %2889 = vmatpush3.bf16.msra.mxu0 %v3190_v56  ;;  %2917 = vmatpush3.bf16.msra.mxu1 %v3191_v58 }
 0xe27   : > { %v2077_v0 = vpop.f32.mrb[28].mxu0  ;;  %v2128_v1 = vpop.f32.mrb[32].mxu1 }
 0xe28   : > { %v3932_v4 = vadd.f32 %v2077_v0, %v3919_v61  ;;  %v3935_v7 = vadd.f32 %v2128_v1, %v3923_v60  ;;  %v2079_v3 = vpop.f32.mrb[29].mxu0  ;;  %v2130_v9 = vpop.f32.mrb[33].mxu1 }
 0xe29   : > { %v3938_v10 = vadd.f32 %v2079_v3, %v3927_v62  ;;  %v3941_v6 = vadd.f32 %v2130_v9, %v3929_v63  ;;  %v2081_v2 = vpop.f32.mrb[30].mxu0  ;;  %v2132_v5 = vpop.f32.mrb[34].mxu1 }
 0xe2a   : > { %v2145_v13 = vmul.f32 %v3932_v4, %v3932_v4  ;;  %v2147_v14 = vmul.f32 %v3935_v7, %v3935_v7  ;;  %v3948_v15 = vadd.f32 %v2081_v2, %v3919_v61  ;;  %v3951_v16 = vadd.f32 %v2132_v5, %v3923_v60  ;;  %v2083_v17 = vpop.f32.mrb[31].mxu0  ;;  %v2134_v18 = vpop.f32.mrb[35].mxu1 }
 0xe2b   : > { %v2146_v26 = vmul.f32 %v3938_v10, %v3938_v10  ;;  %v2148_v36 = vmul.f32 %v3941_v6, %v3941_v6  ;;  %v3958_v19 = vadd.f32 %v2083_v17, %v3927_v62  ;;  %v3961_v23 = vadd.f32 %v2134_v18, %v3929_v63 }
 0xe2c   : > { %v2157_v20 = vmul.f32 %v2145_v13, %v3932_v4  ;;  %v2159_v21 = vmul.f32 %v2147_v14, %v3935_v7  ;;  %v2149_v40 = vmul.f32 %v3948_v15, %v3948_v15  ;;  %v2151_v22 = vmul.f32 %v3951_v16, %v3951_v16 }
 0xe2d   : > { %v2158_v24 = vmul.f32 %v2146_v26, %v3938_v10  ;;  %v2160_v25 = vmul.f32 %v2148_v36, %v3941_v6  ;;  %v2150_v35 = vmul.f32 %v3958_v19, %v3958_v19  ;;  %v2152_v28 = vmul.f32 %v3961_v23, %v3961_v23 }
 0xe2e   : > { %v2169_v29 = vmul.f32 0.044715, %v2157_v20  ;;  %v2171_v31 = vmul.f32 0.044715, %v2159_v21  ;;  %v2161_v27 = vmul.f32 %v2149_v40, %v3948_v15  ;;  %v2163_v32 = vmul.f32 %v2151_v22, %v3951_v16 }
 0xe2f   : > { %v2170_v33 = vmul.f32 0.044715, %v2158_v24  ;;  %v2172_v30 = vmul.f32 0.044715, %v2160_v25  ;;  %v2162_v34 = vmul.f32 %v2150_v35, %v3958_v19  ;;  %v2164_v37 = vmul.f32 %v2152_v28, %v3961_v23  ;;  %v2087_v38 = vpop.f32.mrb[32].mxu0  ;;  %v2138_v39 = vpop.f32.mrb[36].mxu1 }
 0xe30   : > { %v2181_v41 = vadd.f32 %v2169_v29, %v3932_v4  ;;  %v2183_v42 = vadd.f32 %v2171_v31, %v3935_v7  ;;  %v2173_v43 = vmul.f32 0.044715, %v2161_v27  ;;  %v2175_v45 = vmul.f32 0.044715, %v2163_v32  ;;  %v2089_v46 = vpop.f32.mrb[33].mxu0  ;;  %v2140_v47 = vpop.f32.mrb[37].mxu1 }
 0xe31   : > { %v2182_v48 = vadd.f32 %v2170_v33, %v3938_v10  ;;  %v2184_v49 = vadd.f32 %v2172_v30, %v3941_v6  ;;  %v2174_v50 = vmul.f32 0.044715, %v2162_v34  ;;  %v2176_v51 = vmul.f32 0.044715, %v2164_v37  ;;  %v2091_v44 = vpop.f32.mrb[34].mxu0  ;;  %v2142_v52 = vpop.f32.mrb[38].mxu1 }
 0xe32   : > { %v2193_v53 = vmul.f32 0.7978846, %v2181_v41  ;;  %v2195_v54 = vmul.f32 0.7978846, %v2183_v42  ;;  %v2185_v55 = vadd.f32 %v2173_v43, %v3948_v15  ;;  %v2187_v56 = vadd.f32 %v2175_v45, %v3951_v16  ;;  %v2092_v58 = vpop.f32.mrb[35].mxu0  ;;  %v2143_v57 = vpop.f32.mrb[39].mxu1 }
 0xe33   : > { %v2194_v59 = vmul.f32 0.7978846, %v2182_v48  ;;  %v2196_v0 = vmul.f32 0.7978846, %v2184_v49  ;;  %v2186_v1 = vadd.f32 %v2174_v50, %v3958_v19  ;;  %v2188_v3 = vadd.f32 %v2176_v51, %v3961_v23 }
 0xe34   : > { %3252 = vtanh.f32 %v2193_v53  ;;  %v2197_v9 = vmul.f32 0.7978846, %v2185_v55  ;;  %v3988_v2 = vadd.f32 %v2087_v38, %v3919_v61  ;;  %v2199_v5 = vmul.f32 0.7978846, %v2187_v56 }
 0xe35   : > { %3254 = vtanh.f32 %v2195_v54  ;;  %v2198_v13 = vmul.f32 0.7978846, %v2186_v1  ;;  %v3991_v14 = vadd.f32 %v2138_v39, %v3923_v60  ;;  %v3996_v18 = vadd.f32 %v2089_v46, %v3927_v62 }
 0xe36   : > { %3256 = vtanh.f32 %v2194_v59  ;;  %v2153_v17 = vmul.f32 %v3988_v2, %v3988_v2  ;;  %v3999_v26 = vadd.f32 %v2140_v47, %v3929_v63  ;;  %v2200_v36 = vmul.f32 0.7978846, %v2188_v3 }
 0xe37   : > { %3258 = vtanh.f32 %v2196_v0  ;;  %v2155_v61 = vmul.f32 %v3991_v14, %v3991_v14  ;;  %v2154_v60 = vmul.f32 %v3996_v18, %v3996_v18 }
 0xe38   : > { %3260 = vtanh.f32 %v2197_v9  ;;  %v2165_v20 = vmul.f32 %v2153_v17, %v3988_v2  ;;  %v2156_v21 = vmul.f32 %v3999_v26, %v3999_v26 }
 0xe39   : > { %3262 = vtanh.f32 %v2199_v5  ;;  %v2167_v62 = vmul.f32 %v2155_v61, %v3991_v14  ;;  %v2166_v40 = vmul.f32 %v2154_v60, %v3996_v18 }
 0xe3a   : > { %3264 = vtanh.f32 %v2198_v13  ;;  %v2177_v63 = vmul.f32 0.044715, %v2165_v20  ;;  %v2168_v22 = vmul.f32 %v2156_v21, %v3999_v26 }
 0xe3b   : > { %3266 = vtanh.f32 %v2200_v36  ;;  %v2179_v24 = vmul.f32 0.044715, %v2167_v62  ;;  %v2178_v35 = vmul.f32 0.044715, %v2166_v40 }
 0xe3c   : > { %v2189_v25 = vadd.f32 %v2177_v63, %v3988_v2  ;;  %v2180_v28 = vmul.f32 0.044715, %v2168_v22 }
 0xe3d   : > { %v2191_v29 = vadd.f32 %v2179_v24, %v3991_v14  ;;  %v2190_v32 = vadd.f32 %v2178_v35, %v3996_v18 }
 0xe3e   : > { %v3253_v31 = vpop.eup %3252  ;;  %v2201_v27 = vmul.f32 0.7978846, %v2189_v25  ;;  %v2192_v33 = vadd.f32 %v2180_v28, %v3999_v26 }
 0xe3f   : > { %v3255_v30 = vpop.eup %3254  ;;  %v2217_v34 = vadd.f32 1.0, %v3253_v31  ;;  %v2203_v37 = vmul.f32 0.7978846, %v2191_v29  ;;  %v2202_v41 = vmul.f32 0.7978846, %v2190_v32 }
 0xe40   : > { %v3257_v38 = vpop.eup %3256  ;;  %v2219_v39 = vadd.f32 1.0, %v3255_v30  ;;  %3268 = vtanh.f32 %v2201_v27  ;;  %v2204_v42 = vmul.f32 0.7978846, %v2192_v33 }
 0xe41   : > { %v3259_v43 = vpop.eup %3258  ;;  %3270 = vtanh.f32 %v2203_v37  ;;  %v2218_v45 = vadd.f32 1.0, %v3257_v38  ;;  %v2229_v49 = vmul.f32 0.5, %v2217_v34 }
 0xe42   : > { %v3261_v46 = vpop.eup %3260  ;;  %3272 = vtanh.f32 %v2202_v41  ;;  %v2220_v47 = vadd.f32 1.0, %v3259_v43  ;;  %v2231_v44 = vmul.f32 0.5, %v2219_v39 }
 0xe43   : > { %v3263_v48 = vpop.eup %3262  ;;  %v2221_v50 = vadd.f32 1.0, %v3261_v46  ;;  %3274 = vtanh.f32 %v2204_v42  ;;  %v2230_v56 = vmul.f32 0.5, %v2218_v45  ;;  %v2241_v0 = vmul.f32 %v2229_v49, %v3932_v4 }
 0xe44   : > { %v3265_v51 = vpop.eup %3264  ;;  %v2223_v52 = vadd.f32 1.0, %v3263_v48  ;;  %v2232_v59 = vmul.f32 0.5, %v2220_v47  ;;  %v2243_v9 = vmul.f32 %v2231_v44, %v3935_v7 }
 0xe45   : > { %v3267_v53 = vpop.eup %3266  ;;  %v2233_v54 = vmul.f32 0.5, %v2221_v50  ;;  %v2222_v55 = vadd.f32 1.0, %v3265_v51  ;;  %v2242_v36 = vmul.f32 %v2230_v56, %v3938_v10 }
 0xe46   : > { %v2235_v58 = vmul.f32 0.5, %v2223_v52  ;;  %v2224_v57 = vadd.f32 1.0, %v3267_v53  ;;  %v2244_v21 = vmul.f32 %v2232_v59, %v3941_v6 }
 0xe47   : > { %v2245_v1 = vmul.f32 %v2233_v54, %v3948_v15  ;;  %v2234_v3 = vmul.f32 0.5, %v2222_v55 }
 0xe48   : > { %v2247_v5 = vmul.f32 %v2235_v58, %v3951_v16  ;;  %v2236_v13 = vmul.f32 0.5, %v2224_v57 }
 0xe49   : > { %v2253_v17 = vpack.c.bf16 %v2245_v1, %v2241_v0  ;;  %v2246_v61 = vmul.f32 %v2234_v3, %v3958_v19 }
 0xe4a   : > { %v3269_v20 = vpop.eup %3268  ;;  %v2255_v60 = vpack.c.bf16 %v2247_v5, %v2243_v9  ;;  %v2248_v62 = vmul.f32 %v2236_v13, %v3961_v23 }
 0xe4b   : > { %v3271_v4 = vpop.eup %3270  ;;  %v2254_v63 = vpack.c.bf16 %v2246_v61, %v2242_v36  ;;  %v2225_v15 = vadd.f32 1.0, %v3269_v20 }
 0xe4c   : > { %v3273_v40 = vpop.eup %3272  ;;  %v2256_v22 = vpack.c.bf16 %v2248_v62, %v2244_v21  ;;  %v2227_v7 = vadd.f32 1.0, %v3271_v4 }
 0xe4d   : > { %v3275_v24 = vpop.eup %3274  ;;  %2556 = vmatprep.mubr.bf16.mxu0 %v2254_v63  ;;  %v2226_v16 = vadd.f32 1.0, %v3273_v40  ;;  %v2237_v25 = vmul.f32 0.5, %v2225_v15 }
 0xe4e   : > { %2604 = vmatprep.mubr.bf16.mxu1 %v2256_v22  ;;  %2557 = vmatmul.mubr.bf16.vlgmr.msra.gmra.mrb[36].mxu0 %v2253_v17  ;;  %v2228_v10 = vadd.f32 1.0, %v3275_v24  ;;  %v2239_v19 = vmul.f32 0.5, %v2227_v7 }
 0xe4f   : > { %2605 = vmatmul.mubr.bf16.vlgmr.msra.gmra.mrb[40].mxu1 %v2255_v60  ;;  %v2238_v35 = vmul.f32 0.5, %v2226_v16  ;;  %v2249_v6 = vmul.f32 %v2237_v25, %v3988_v2  ;;  %v2781_v2 = vld [vmem:[%s4053_s12] ss:$0 sm:$0xff] }
 0xe50   : > { %v2240_v28 = vmul.f32 0.5, %v2228_v10  ;;  %v2251_v29 = vmul.f32 %v2239_v19, %v3991_v14 }
 0xe51   : > { %v2250_v23 = vmul.f32 %v2238_v35, %v3996_v18  ;;  %v2257_v33 = vpack.c.bf16 %v2249_v6, %v2249_v6 }
 0xe52   : > { %v2252_v31 = vmul.f32 %v2240_v28, %v3999_v26  ;;  %v2259_v30 = vpack.c.bf16 %v2251_v29, %v2251_v29 }
 0xe53   : > { %v2258_v27 = vpack.c.bf16 %v2250_v23, %v2250_v23 }
 0xe54   : > { %v2260_v32 = vpack.c.bf16 %v2252_v31, %v2252_v31 }
 0xe55   : > { %2564 = vmatprep.mubr.bf16.mxu0 %v2258_v27 }
 0xe56   : > { %2612 = vmatprep.mubr.bf16.mxu1 %v2260_v32  ;;  %2565 = vmatmul.mubr.bf16.gmra.mrb[40].mxu0 %v2257_v33 }
 0xe57   : > { %2613 = vmatmul.mubr.bf16.gmra.mrb[44].mxu1 %v2259_v30 }
 0xf21   : > { %v2890_v34 = vpop.f32.mrb[36].mxu0 }
 0xf22   : > { %v2918_v37 = vpop.f32.mrb[40].mxu1  ;;  %v2891_v18 = vpop.f32.mrb[37].mxu0 }
 0xf23   : > { %v2892_v38 = vadd.f32 %v2891_v18, %v2890_v34  ;;  %v2919_v14 = vpop.f32.mrb[41].mxu1  ;;  %v2893_v39 = vpop.f32.mrb[38].mxu0 }
 0xf24   : > { %v2920_v26 = vadd.f32 %v2919_v14, %v2918_v37  ;;  %v2921_v41 = vpop.f32.mrb[42].mxu1  ;;  %v2894_v42 = vpop.f32.mrb[39].mxu0 }
 0xf25   : > { %v2559_v43 = vadd.f32 %v2892_v38, %v2781_v2  ;;  %v2895_v45 = vadd.f32 %v2894_v42, %v2893_v39  ;;  %v2922_v46 = vpop.f32.mrb[43].mxu1 }
 0xf26   : > { %v2923_v47 = vadd.f32 %v2922_v46, %v2921_v41 }
 0xf27   : > { %v2607_v48 = vadd.f32 %v2920_v26, %v2559_v43  ;;  %v2562_v49 = vadd.f32 %v2895_v45, %v2781_v2 }
 0xf29   : > { %v2620_v50 = vadd.f32 %v2607_v48, %v3685_v8  ;;  %v2610_v51 = vadd.f32 %v2923_v47, %v2562_v49  ;;  %v2896_v44 = vpop.f32.mrb[40].mxu0 }
 0xf2a   : > { %v2924_v52 = vpop.f32.mrb[44].mxu1  ;;  %v2897_v53 = vpop.f32.mrb[41].mxu0 }
 0xf2b   : > { %2623 = vst [vmem:[%s440_s22] sm:$0xff] %v2620_v50  ;;  %v2621_v54 = vadd.f32 %v2610_v51, %v3689_v11  ;;  %v2898_v55 = vadd.f32 %v2897_v53, %v2896_v44  ;;  %v2925_v56 = vpop.f32.mrb[45].mxu1  ;;  %v2899_v58 = vpop.f32.mrb[42].mxu0 }
 0xf2c   : > { %v2926_v57 = vadd.f32 %v2925_v56, %v2924_v52  ;;  %v2927_v59 = vpop.f32.mrb[46].mxu1  ;;  %v2900_v0 = vpop.f32.mrb[43].mxu0 }
 0xf2d   : > { %2624 = vst [vmem:[%s440_s22 + $0x8] sm:$0xff] %v2621_v54  ;;  %v2567_v1 = vadd.f32 %v2898_v55, %v2781_v2  ;;  %v2928_v3 = vpop.f32.mrb[47].mxu1 }
 0xf2f   : > { %v2615_v9 = vadd.f32 %v2926_v57, %v2567_v1 }
 0xf31   : > { %v2622_v5 = vadd.f32 %v2615_v9, %v3692_v12 }
 0xf33   : > { %2625 = vst [vmem:[%s440_s22 + $0x10] sm:$0xff] %v2622_v5 }
 0xf34 PF: > { %s23_s25 = sadd.s32 1, %s3285_s25  }
 0xf35   : > { %p20_p4 = scmp.ge.s32.totalorder %s23_s25, 4  }
 0xf37   :  { %22 = sbr.rel (!%p20_p4) target bundleno = 1 (0x1), region = 102 }

</bundles_post_ra>
